<compile_context>
chip_gen: v6e
topology: v6e:2x2x1
jax: 0.10.0
libtpu: 0.0.40
codegen_flags: <defaults>
</compile_context>

<pallas_src>
import jax
import jax.numpy as jnp
from jax.experimental import pallas as pl
from jax.experimental.pallas import tpu as pltpu

TM = 1024                     # tile along flattened N*D*H*W for the pointwise stage
VMEM_LIMIT = 32 * 1024 * 1024


# ------------------------------------------------------------------ kernels --

def fused_in_kernel(x_ref, sc1_ref, sh1_ref, w1_ref, sc2_ref, sh2_ref, w2_ref,
                    o_ref):
    """x2 = relu(bn2(relu(bn1(x)) @ W1)) @ W2 for one (TM, Cin) tile.

    Note: with demo channel counts (Cin=8, C4=2, Cm=8) the MXU is badly
    underfilled; for production channel counts (>=128) this is the right unit.
    """
    h = jnp.maximum(x_ref[...] * sc1_ref[...] + sh1_ref[...], 0.0)
    h1 = jnp.dot(h, w1_ref[...], preferred_element_type=jnp.float32)
    h2 = jnp.maximum(h1 * sc2_ref[...] + sh2_ref[...], 0.0)
    o_ref[...] = jnp.dot(h2, w2_ref[...], preferred_element_type=jnp.float32)


def make_branch_kernel(dilations, pad, td, D, H, W, Cm, Cout):
    """Three dilated 3x3x3 branches fused + tail bn_m2+ReLU.

    Computes TD activated output planes a3[d] = relu(bn_m2(x3[d])) per grid step
    from TD + 2*pad depth planes of the zero-padded x2.  Per-branch BN+ReLU is
    applied in-kernel; halo positions are zeroed with a static H/W border mask
    and a dynamic depth-plane gate so they contribute exactly zero (matching the
    reference conv's zero padding of relu(bn(x2)))."""
    n_planes = td + 2 * pad

    def kernel(*refs):
        planes = refs[:n_planes]
        (mask_ref, sc_ref, sh_ref, w_ref, scm_ref, shm_ref,
         o_ref, acc_ref) = refs[n_planes:]
        dB = pl.program_id(1)
        hw_mask = mask_ref[...]                               # (Hp, Wp, 1)
        for j in range(td):                                   # output depth plane
            d_out = dB * td + j
            first = True
            for bi, dil in enumerate(dilations):
                scale = sc_ref[bi]                            # (1, 1, Cm)
                shift = sh_ref[bi]
                for a in range(3):                            # depth tap
                    off = (a - 1) * dil
                    plane = planes[j + pad + off][0, 0]       # (Hp, Wp, Cm)
                    inb = jnp.logical_and(d_out + off >= 0, d_out + off < D)
                    gate = jnp.where(inb, 1.0, 0.0)
                    act = jnp.maximum(plane * scale + shift, 0.0) * (hw_mask * gate)
                    # build the (H*W, 9*Cm) patch once and do ONE fat matmul
                    cols = []
                    for b in range(3):                        # height tap
                        hy = pad + (b - 1) * dil
                        for c in range(3):                    # width tap
                            wx = pad + (c - 1) * dil
                            cols.append(act[hy:hy + H, wx:wx + W, :])
                    patch = jnp.concatenate(cols, axis=-1).reshape(H * W, 9 * Cm)
                    contrib = jnp.dot(patch, w_ref[bi * 3 + a],
                                      preferred_element_type=jnp.float32)
                    if first:
                        acc_ref[...] = contrib
                        first = False
                    else:
                        acc_ref[...] += contrib
            a3 = jnp.maximum(acc_ref[...] * scm_ref[...] + shm_ref[...], 0.0)
            o_ref[0, j] = a3.reshape(H, W * Cout)             # lane-dense store

    return kernel


def make_m2_kernel(td, H, W, Cin, Cout):
    """conv3x3x1 over the pre-activated, zero-padded a3 plus the fused shortcut
    (relu(bn_sc(x)) @ W_sc).  TD output planes per grid step."""
    n_planes = td + 2

    def kernel(*refs):
        planes = refs[:n_planes]
        x_ref, w_ref, wsc_ref, scs_ref, shs_ref, o_ref, acc_ref = refs[n_planes:]
        for j in range(td):
            # shortcut branch: initialize the accumulator with its matmul
            xin = x_ref[0, j]                                 # (H, W, Cin)
            hsc = jnp.maximum(xin * scs_ref[...] + shs_ref[...], 0.0)
            acc_ref[...] = jnp.dot(hsc.reshape(H * W, Cin), wsc_ref[...],
                                   preferred_element_type=jnp.float32)
            for a in range(3):                                # depth tap
                plane = planes[j + a][0, 0].reshape(H + 2, W, Cout)
                patch = jnp.concatenate([plane[b:b + H] for b in range(3)],
                                        axis=-1).reshape(H * W, 3 * Cout)
                acc_ref[...] += jnp.dot(patch, w_ref[a],
                                        preferred_element_type=jnp.float32)
            o_ref[0, j] = acc_ref[...].reshape(H, W * Cout)   # lane-dense store

    return kernel


# ----------------------------------------------------------------- wrappers --

def fused_in_conv(x2d, sc1, sh1, w1, sc2, sh2, w2, tm=TM):
    M, Cin = x2d.shape
    C4 = w1.shape[1]
    Cm = w2.shape[1]
    mp = pl.cdiv(M, tm) * tm
    xp = jnp.pad(x2d, ((0, mp - M), (0, 0))) if mp != M else x2d
    out = pl.pallas_call(
        fused_in_kernel,
        out_shape=jax.ShapeDtypeStruct((mp, Cm), jnp.float32),
        grid_spec=pltpu.PrefetchScalarGridSpec(
            num_scalar_prefetch=0, grid=(mp // tm,),
            in_specs=[
                pl.BlockSpec((tm, Cin), lambda i: (i, 0)),
                pl.BlockSpec((1, Cin), lambda i: (0, 0)),
                pl.BlockSpec((1, Cin), lambda i: (0, 0)),
                pl.BlockSpec((Cin, C4), lambda i: (0, 0)),
                pl.BlockSpec((1, C4), lambda i: (0, 0)),
                pl.BlockSpec((1, C4), lambda i: (0, 0)),
                pl.BlockSpec((C4, Cm), lambda i: (0, 0)),
            ],
            out_specs=pl.BlockSpec((tm, Cm), lambda i: (i, 0)),
        ),
        compiler_params=pltpu.CompilerParams(
            dimension_semantics=("parallel",),
            vmem_limit_bytes=VMEM_LIMIT),
    )(xp, sc1, sh1, w1, sc2, sh2, w2)
    return out[:M] if mp != M else out


def dilated_branch_conv(x2p, hw_mask, w_br, sc_br, sh_br, sc_m2, sh_m2,
                        out_dims, dilations, pad, td):
    N, D, H, W = out_dims
    Cout = w_br.shape[-1]
    _, Dp, Hp, Wp, Cm = x2p.shape
    n_planes = td + 2 * pad
    plane_specs = [
        pl.BlockSpec((1, 1, Hp, Wp, Cm),
                     lambda n, dB, _m=m: (n, dB * td + _m, 0, 0, 0))
        for m in range(n_planes)
    ]
    return pl.pallas_call(
        make_branch_kernel(dilations, pad, td, D, H, W, Cm, Cout),
        out_shape=jax.ShapeDtypeStruct((N, D, H, W * Cout), jnp.float32),
        grid_spec=pltpu.PrefetchScalarGridSpec(
            num_scalar_prefetch=0, grid=(N, D // td),
            in_specs=plane_specs + [
                pl.BlockSpec((Hp, Wp, 1), lambda n, dB: (0, 0, 0)),
                pl.BlockSpec((3, 1, 1, Cm), lambda n, dB: (0, 0, 0, 0)),
                pl.BlockSpec((3, 1, 1, Cm), lambda n, dB: (0, 0, 0, 0)),
                pl.BlockSpec((9, 9 * Cm, Cout), lambda n, dB: (0, 0, 0)),
                pl.BlockSpec((1, Cout), lambda n, dB: (0, 0)),
                pl.BlockSpec((1, Cout), lambda n, dB: (0, 0)),
            ],
            out_specs=pl.BlockSpec((1, td, H, W * Cout),
                                   lambda n, dB: (n, dB, 0, 0)),
            scratch_shapes=[pltpu.VMEM((H * W, Cout), jnp.float32)],
        ),
        compiler_params=pltpu.CompilerParams(
            dimension_semantics=("parallel", "parallel"),
            vmem_limit_bytes=VMEM_LIMIT),
    )(*([x2p] * n_planes), hw_mask, sc_br, sh_br, w_br, sc_m2, sh_m2)


def m2_shortcut_conv(a3p, x, w_m2, w_sc, sc_sc, sh_sc, td):
    N, Dp2, Hp2, WC = a3p.shape
    D, H = Dp2 - 2, Hp2 - 2
    Cin = x.shape[-1]
    Cout = w_m2.shape[-1]
    W = WC // Cout
    n_planes = td + 2
    plane_specs = [
        pl.BlockSpec((1, 1, Hp2, WC),
                     lambda n, dB, _m=m: (n, dB * td + _m, 0, 0))
        for m in range(n_planes)
    ]
    return pl.pallas_call(
        make_m2_kernel(td, H, W, Cin, Cout),
        out_shape=jax.ShapeDtypeStruct((N, D, H, WC), jnp.float32),
        grid_spec=pltpu.PrefetchScalarGridSpec(
            num_scalar_prefetch=0, grid=(N, D // td),
            in_specs=plane_specs + [
                pl.BlockSpec((1, td, H, W, Cin), lambda n, dB: (n, dB, 0, 0, 0)),
                pl.BlockSpec((3, 3 * Cout, Cout), lambda n, dB: (0, 0, 0)),
                pl.BlockSpec((Cin, Cout), lambda n, dB: (0, 0)),
                pl.BlockSpec((1, 1, Cin), lambda n, dB: (0, 0, 0)),
                pl.BlockSpec((1, 1, Cin), lambda n, dB: (0, 0, 0)),
            ],
            out_specs=pl.BlockSpec((1, td, H, WC), lambda n, dB: (n, dB, 0, 0)),
            scratch_shapes=[pltpu.VMEM((H * W, Cout), jnp.float32)],
        ),
        compiler_params=pltpu.CompilerParams(
            dimension_semantics=("parallel", "parallel"),
            vmem_limit_bytes=VMEM_LIMIT),
    )(*([a3p] * n_planes), x, w_m2, w_sc, sc_sc, sh_sc)


# -------------------------------------------------------------------- glue --

def prepare_params(p):
    """Pack/reshape parameters once (branch scalars folded into conv weights,
    per-(branch, depth-tap) weight slabs of shape (9*Cm, Cout))."""
    Cin = p['w_in1'].shape[0]
    Cm = p['w_in2'].shape[1]
    Cout = p['w_m1'][0].shape[-1]
    w_br = jnp.concatenate(
        [(p['branch_w'][i] * p['w_m1'][i]).reshape(3, 9 * Cm, Cout)
         for i in range(3)], axis=0)                    # (9, 9*Cm, Cout), bi*3 + a
    return dict(
        sc1=p['bn1_scale'], sh1=p['bn1_shift'], w1=p['w_in1'],
        sc2=p['bn2_scale'], sh2=p['bn2_shift'], w2=p['w_in2'],
        w_br=w_br,
        sc_br=jnp.stack([p['bn_m1_scale'][i].reshape(1, 1, Cm) for i in range(3)]),
        sh_br=jnp.stack([p['bn_m1_shift'][i].reshape(1, 1, Cm) for i in range(3)]),
        sc_m2=p['bn_m2_scale'].reshape(1, Cout),
        sh_m2=p['bn_m2_shift'].reshape(1, Cout),
        w_m2=p['w_m2'].reshape(3, 3 * Cout, Cout),      # (a, kh*Cout+ci, Cout)
        w_sc=p['w_sc'],
        sc_sc=p['bn_sc_scale'].reshape(1, 1, Cin),
        sh_sc=p['bn_sc_shift'].reshape(1, 1, Cin),
    )


def dmf_unit_forward(x, q, dilations=(1, 2, 3)):
    """x: (N, D, H, W, num_in) float32 -> (N, D, H, W, num_out)."""
    N, D, H, W, Cin = x.shape
    M = N * D * H * W
    Cm = q['w2'].shape[1]
    Cout = q['w_br'].shape[-1]
    pad = max(dilations)
    td = next(t for t in (4, 2, 1) if D % t == 0)       # depth planes per grid step

    # stage A: fused conv1x1x1_in1 + conv1x1x1_in2 (no x1 round-trip)
    x2 = fused_in_conv(x.reshape(M, Cin), q['sc1'], q['sh1'], q['w1'],
                       q['sc2'], q['sh2'], q['w2'])
    x2 = x2.reshape(N, D, H, W, Cm)

    # stage B: three dilated 3x3x3 branches + fused bn_m2+ReLU tail
    x2p = jnp.pad(x2, ((0, 0), (pad, pad), (pad, pad), (pad, pad), (0, 0)))
    Hp, Wp = H + 2 * pad, W + 2 * pad
    rows = jnp.arange(Hp)
    cols = jnp.arange(Wp)
    hw_mask = ((rows[:, None] >= pad) & (rows[:, None] < pad + H) &
               (cols[None, :] >= pad) & (cols[None, :] < pad + W))
    hw_mask = hw_mask.astype(jnp.float32)[:, :, None]   # (Hp, Wp, 1)
    a3 = dilated_branch_conv(x2p, hw_mask, q['w_br'], q['sc_br'], q['sh_br'],
                             q['sc_m2'], q['sh_m2'], (N, D, H, W),
                             dilations, pad, td)        # (N, D, H, W*Cout) activated

    # stage C: conv3x3x1 on the activated a3 + fused shortcut
    a3p = jnp.pad(a3, ((0, 0), (1, 1), (1, 1), (0, 0)))
    out = m2_shortcut_conv(a3p, x, q['w_m2'], q['w_sc'], q['sc_sc'], q['sh_sc'], td)
    return out.reshape(N, D, H, W, Cout)


# ----------------------------------------------------------------- reference -

def ref_forward(x, p):
    def bnrelu(z, sc, sh):
        return jnp.maximum(z * sc.reshape(1, 1, 1, 1, -1) +
                           sh.reshape(1, 1, 1, 1, -1), 0.0)

    def conv1x1(z, w):
        return jnp.einsum('ndhwc,co->ndhwo', z, w)

    def conv3d(z, w, dil):
        pads = [((k - 1) // 2 * d, (k - 1) // 2 * d)
                for k, d in zip(w.shape[:3], dil)]
        return jax.lax.conv_general_dilated(
            z, w, window_strides=(1, 1, 1), padding=pads, rhs_dilation=dil,
            dimension_numbers=('NDHWC', 'DHWIO', 'NDHWC'))

    x1 = conv1x1(bnrelu(x, p['bn1_scale'], p['bn1_shift']), p['w_in1'])
    x2 = conv1x1(bnrelu(x1, p['bn2_scale'], p['bn2_shift']), p['w_in2'])
    x3 = 0.0
    for i, d in enumerate((1, 2, 3)):
        h = bnrelu(x2, p['bn_m1_scale'][i], p['bn_m1_shift'][i])
        x3 = x3 + p['branch_w'][i] * conv3d(h, p['w_m1'][i], (d, d, d))
    x4 = conv3d(bnrelu(x3, p['bn_m2_scale'], p['bn_m2_shift']), p['w_m2'],
                (1, 1, 1))
    sc = conv1x1(bnrelu(x, p['bn_sc_scale'], p['bn_sc_shift']), p['w_sc'])
    return x4 + sc


# ------------------------------------------------------------------- params --

def init_params(key, num_in, num_out):
    num_mid = num_in if num_in <= num_out else num_out
    keys = iter(jax.random.split(key, 32))

    def bn(c):  # eval-mode BN folded to scale/shift
        gamma = 1.0 + 0.1 * jax.random.normal(next(keys), (c,), jnp.float32)
        beta = 0.1 * jax.random.normal(next(keys), (c,), jnp.float32)
        rm = jnp.zeros((c,), jnp.float32)
        rv = jnp.ones((c,), jnp.float32)
        scale = gamma * jax.lax.rsqrt(rv + 1e-5)
        shift = beta - rm * scale
        return scale.reshape(1, c), shift.reshape(1, c)

    def conv_w(shape):
        return 0.1 * jax.random.normal(next(keys), shape, jnp.float32)

    p = {}
    p['bn1_scale'], p['bn1_shift'] = bn(num_in)
    p['w_in1'] = conv_w((num_in, num_in // 4))
    p['bn2_scale'], p['bn2_shift'] = bn(num_in // 4)
    p['w_in2'] = conv_w((num_in // 4, num_mid))
    p['bn_m1_scale'], p['bn_m1_shift'], p['w_m1'], p['branch_w'] = [], [], [], []
    for _ in range(3):
        s, sh = bn(num_mid)
        p['bn_m1_scale'].append(s)
        p['bn_m1_shift'].append(sh)
        p['w_m1'].append(conv_w((3, 3, 3, num_mid, num_out)))
        p['branch_w'].append(jnp.ones((1,), jnp.float32))  # weight1/2/3
    p['bn_m2_scale'], p['bn_m2_shift'] = bn(num_out)
    p['w_m2'] = conv_w((3, 3, 1, num_out, num_out))
    p['bn_sc_scale'], p['bn_sc_shift'] = bn(num_in)
    p['w_sc'] = conv_w((num_in, num_out))
    return p


if __name__ == "__main__":
    key = jax.random.PRNGKey(0)
    kx, kp = jax.random.split(key)

    N, num_in, num_out = 2, 8, 16
    D = H = W = 8
    x = jax.random.normal(kx, (N, D, H, W, num_in), jnp.float32)
    params = init_params(kp, num_in, num_out)
    packed = prepare_params(params)

    out = dmf_unit_forward(x, packed)
    out = jax.block_until_ready(out)

    ref = ref_forward(x, params)
    assert out.shape == (N, D, H, W, num_out)
    err = float(jnp.max(jnp.abs(out - ref)))
    assert err < 1e-3, f"max abs error {err}"
    print("KERNEL_OK")
</pallas_src>

<mosaic_0001>
module attributes {stable_mosaic.version = 11 : i64} {
  func.func @fused_in_kernel(%arg0: i32, %arg1: memref<1024x8xf32, #tpu.memory_space<vmem>>, %arg2: memref<1x8xf32, #tpu.memory_space<vmem>>, %arg3: memref<1x8xf32, #tpu.memory_space<vmem>>, %arg4: memref<8x2xf32, #tpu.memory_space<vmem>>, %arg5: memref<1x2xf32, #tpu.memory_space<vmem>>, %arg6: memref<1x2xf32, #tpu.memory_space<vmem>>, %arg7: memref<2x8xf32, #tpu.memory_space<vmem>>, %arg8: memref<1024x8xf32, #tpu.memory_space<vmem>>) attributes {dimension_semantics = [#tpu.dimension_semantics<parallel>], iteration_bounds = array<i64: 1>, scalar_prefetch = 0 : i64, scratch_operands = 0 : i64, tpu.core_type = #tpu.core_type<tc>, window_params = [{transform_indices = @transform_0, window_bounds = array<i64: 1024, 8>}, {pipeline_mode = #tpu.pipeline_mode<synchronous>, transform_indices = @transform_1, window_bounds = array<i64: 1, 8>}, {pipeline_mode = #tpu.pipeline_mode<synchronous>, transform_indices = @transform_2, window_bounds = array<i64: 1, 8>}, {pipeline_mode = #tpu.pipeline_mode<synchronous>, transform_indices = @transform_3, window_bounds = array<i64: 8, 2>}, {pipeline_mode = #tpu.pipeline_mode<synchronous>, transform_indices = @transform_4, window_bounds = array<i64: 1, 2>}, {pipeline_mode = #tpu.pipeline_mode<synchronous>, transform_indices = @transform_5, window_bounds = array<i64: 1, 2>}, {pipeline_mode = #tpu.pipeline_mode<synchronous>, transform_indices = @transform_6, window_bounds = array<i64: 2, 8>}, {transform_indices = @transform_7, window_bounds = array<i64: 1024, 8>}]} {
    %c0 = arith.constant 0 : index
    %c0_0 = arith.constant 0 : index
    %0 = vector.load %arg1[%c0, %c0_0] : memref<1024x8xf32, #tpu.memory_space<vmem>>, vector<1024x8xf32>
    %c0_1 = arith.constant 0 : index
    %c0_2 = arith.constant 0 : index
    %1 = vector.load %arg2[%c0_1, %c0_2] : memref<1x8xf32, #tpu.memory_space<vmem>>, vector<1x8xf32>
    %2 = vector.broadcast %1 : vector<1x8xf32> to vector<1024x8xf32>
    %3 = arith.mulf %0, %2 : vector<1024x8xf32>
    %c0_3 = arith.constant 0 : index
    %c0_4 = arith.constant 0 : index
    %4 = vector.load %arg3[%c0_3, %c0_4] : memref<1x8xf32, #tpu.memory_space<vmem>>, vector<1x8xf32>
    %5 = vector.broadcast %4 : vector<1x8xf32> to vector<1024x8xf32>
    %6 = arith.addf %3, %5 : vector<1024x8xf32>
    %cst = arith.constant 0.000000e+00 : f32
    %7 = vector.broadcast %cst : f32 to vector<1024x8xf32>
    %8 = arith.maximumf %6, %7 : vector<1024x8xf32>
    %c0_5 = arith.constant 0 : index
    %c0_6 = arith.constant 0 : index
    %9 = vector.load %arg4[%c0_5, %c0_6] : memref<8x2xf32, #tpu.memory_space<vmem>>, vector<8x2xf32>
    %cst_7 = arith.constant dense<0.000000e+00> : vector<1024x2xf32>
    %10 = tpu.matmul %8, %9, %cst_7 {dimension_numbers = #tpu.dot_dimension_numbers<[1], [0], [0], [1], [0, 0, 1, 1], [], []>} : vector<1024x8xf32>, vector<8x2xf32>, vector<1024x2xf32> -> vector<1024x2xf32>
    %c0_8 = arith.constant 0 : index
    %c0_9 = arith.constant 0 : index
    %11 = vector.load %arg5[%c0_8, %c0_9] : memref<1x2xf32, #tpu.memory_space<vmem>>, vector<1x2xf32>
    %12 = vector.broadcast %11 : vector<1x2xf32> to vector<1024x2xf32>
    %13 = arith.mulf %10, %12 : vector<1024x2xf32>
    %c0_10 = arith.constant 0 : index
    %c0_11 = arith.constant 0 : index
    %14 = vector.load %arg6[%c0_10, %c0_11] : memref<1x2xf32, #tpu.memory_space<vmem>>, vector<1x2xf32>
    %15 = vector.broadcast %14 : vector<1x2xf32> to vector<1024x2xf32>
    %16 = arith.addf %13, %15 : vector<1024x2xf32>
    %cst_12 = arith.constant 0.000000e+00 : f32
    %17 = vector.broadcast %cst_12 : f32 to vector<1024x2xf32>
    %18 = arith.maximumf %16, %17 : vector<1024x2xf32>
    %c0_13 = arith.constant 0 : index
    %c0_14 = arith.constant 0 : index
    %19 = vector.load %arg7[%c0_13, %c0_14] : memref<2x8xf32, #tpu.memory_space<vmem>>, vector<2x8xf32>
    %cst_15 = arith.constant dense<0.000000e+00> : vector<1024x8xf32>
    %20 = tpu.matmul %18, %19, %cst_15 {dimension_numbers = #tpu.dot_dimension_numbers<[1], [0], [0], [1], [0, 0, 1, 1], [], []>} : vector<1024x2xf32>, vector<2x8xf32>, vector<1024x8xf32> -> vector<1024x8xf32>
    %c0_16 = arith.constant 0 : index
    %c0_17 = arith.constant 0 : index
    %21 = vector.load %arg8[%c0_16, %c0_17] : memref<1024x8xf32, #tpu.memory_space<vmem>>, vector<1024x8xf32>
    tpu.vector_store %arg8[%c0_16, %c0_17], %20 {strides = array<i32>} : memref<1024x8xf32, #tpu.memory_space<vmem>>, vector<1024x8xf32>,
    return
  }
  func.func @transform_0(%arg0: i32) -> (i32, i32) {
    %c0_i32 = arith.constant 0 : i32
    %c0_i32_0 = arith.constant 0 : i32
    return %arg0, %c0_i32 : i32, i32
  }
  func.func @transform_1(%arg0: i32) -> (i32, i32) {
    %c0_i32 = arith.constant 0 : i32
    %c0_i32_0 = arith.constant 0 : i32
    %c0_i32_1 = arith.constant 0 : i32
    return %c0_i32, %c0_i32_0 : i32, i32
  }
  func.func @transform_2(%arg0: i32) -> (i32, i32) {
    %c0_i32 = arith.constant 0 : i32
    %c0_i32_0 = arith.constant 0 : i32
    %c0_i32_1 = arith.constant 0 : i32
    return %c0_i32, %c0_i32_0 : i32, i32
  }
  func.func @transform_3(%arg0: i32) -> (i32, i32) {
    %c0_i32 = arith.constant 0 : i32
    %c0_i32_0 = arith.constant 0 : i32
    %c0_i32_1 = arith.constant 0 : i32
    return %c0_i32, %c0_i32_0 : i32, i32
  }
  func.func @transform_4(%arg0: i32) -> (i32, i32) {
    %c0_i32 = arith.constant 0 : i32
    %c0_i32_0 = arith.constant 0 : i32
    %c0_i32_1 = arith.constant 0 : i32
    return %c0_i32, %c0_i32_0 : i32, i32
  }
  func.func @transform_5(%arg0: i32) -> (i32, i32) {
    %c0_i32 = arith.constant 0 : i32
    %c0_i32_0 = arith.constant 0 : i32
    %c0_i32_1 = arith.constant 0 : i32
    return %c0_i32, %c0_i32_0 : i32, i32
  }
  func.func @transform_6(%arg0: i32) -> (i32, i32) {
    %c0_i32 = arith.constant 0 : i32
    %c0_i32_0 = arith.constant 0 : i32
    %c0_i32_1 = arith.constant 0 : i32
    return %c0_i32, %c0_i32_0 : i32, i32
  }
  func.func @transform_7(%arg0: i32) -> (i32, i32) {
    %c0_i32 = arith.constant 0 : i32
    %c0_i32_0 = arith.constant 0 : i32
    return %arg0, %c0_i32 : i32, i32
  }
}

</mosaic_0001>

<bundles_post_ra>
// kernel: tpu_custom_call.1
= control target key start
LH: loop header
LB: loop body
LE: loop exit
PB: predicated region body
PF: predicated region fallthrough
CT: control target
= control target key end

     0   :  { %vm553_vm0 = vcmask 64512   ;;  %vm2427_vm1 = vcmask 1041408   ;;  %vm2042_vm2 = vcmask 15360   ;;  %s5929_s3 = inlined_call_operand.vmem [shape: f32[8,2], index: 3, kind: input, shape index: {}]   ;;  %s5930_s0 = inlined_call_operand.vmem [shape: f32[1024,8], index: 0, kind: input, shape index: {}]   ;;  %s5931_s1 = inlined_call_operand.vmem [shape: f32[1,8], index: 1, kind: input, shape index: {}]   ;;  %s5932_s2 = inlined_call_operand.vmem [shape: f32[1,8], index: 2, kind: input, shape index: {}]   ;;  %s5933_s6 = inlined_call_operand.vmem [shape: f32[2,8], index: 6, kind: input, shape index: {}]   ;;  %s5934_s4 = inlined_call_operand.vmem [shape: f32[1,2], index: 4, kind: input, shape index: {}]   ;;  %s5935_s5 = inlined_call_operand.vmem [shape: f32[1,2], index: 5, kind: input, shape index: {}]   ;;  %s5936_s7 = inlined_call_operand.vmem [shape: f32[1024,8], index: 7, kind: output, shape index: {}]  }
   0x1   :  { %v552_v0 = vld [vmem:[%s5929_s3] sm:$0xff]  ;;  %v27_v5 = vld [vmem:[%s5930_s0 + $0x8] sm:$0xff]  ;;  %v28_v6 = vld [vmem:[%s5930_s0 + $0x10] sm:$0xff] }
   0x2   :  { %v26_v1 = vld [vmem:[%s5930_s0] sm:$0xff]  ;;  %3787 = vmatprep.subr.mxu0 %v552_v0  ;;  %v29_v9 = vld [vmem:[%s5930_s0 + $0x18] sm:$0xff]  ;;  %v31_v11 = vld [vmem:[%s5930_s0 + $0x28] sm:$0xff] }
   0x3   :  { %v4228_v2 = vld [vmem:[%s5931_s1] ss:$0 sm:$0xff]  ;;  %3788 = vmatpush3.msra.mxu0 %v552_v0  ;;  %v32_v15 = vld [vmem:[%s5930_s0 + $0x30] sm:$0xff]  ;;  %v33_v23 = vld [vmem:[%s5930_s0 + $0x38] sm:$0xff] }
   0x4   :  { %v161_v3 = vmul.f32 %v4228_v2, %v26_v1  ;;  %v4234_v4 = vld [vmem:[%s5932_s2] ss:$0 sm:$0xff]  ;;  %v162_v7 = vmul.f32 %v4228_v2, %v27_v5  ;;  %v163_v8 = vmul.f32 %v4228_v2, %v28_v6  ;;  %v164_v13 = vmul.f32 %v4228_v2, %v29_v9  ;;  %v35_v33 = vld [vmem:[%s5930_s0 + $0x48] sm:$0xff]  ;;  %v36_v34 = vld [vmem:[%s5930_s0 + $0x50] sm:$0xff] }
   0x5   :  { %v30_v10 = vld [vmem:[%s5930_s0 + $0x20] sm:$0xff]  ;;  %v166_v18 = vmul.f32 %v4228_v2, %v31_v11  ;;  %v167_v22 = vmul.f32 %v4228_v2, %v32_v15  ;;  %v168_v29 = vmul.f32 %v4228_v2, %v33_v23  ;;  %v170_v37 = vmul.f32 %v4228_v2, %v35_v33  ;;  %v37_v41 = vld [vmem:[%s5930_s0 + $0x58] sm:$0xff]  ;;  %v39_v49 = vld [vmem:[%s5930_s0 + $0x68] sm:$0xff] }
   0x6   :  { %v296_v12 = vadd.f32 %v4234_v4, %v161_v3  ;;  %v165_v14 = vmul.f32 %v4228_v2, %v30_v10  ;;  %v297_v16 = vadd.f32 %v4234_v4, %v162_v7  ;;  %v298_v17 = vadd.f32 %v4234_v4, %v163_v8  ;;  %v34_v26 = vld [vmem:[%s5930_s0 + $0x40] sm:$0xff]  ;;  %v40_v50 = vld [vmem:[%s5930_s0 + $0x70] sm:$0xff]  ;;  %v41_v57 = vld [vmem:[%s5930_s0 + $0x78] sm:$0xff] }
   0x7   :  { %v299_v20 = vadd.f32 %v4234_v4, %v164_v13  ;;  %v301_v28 = vadd.f32 %v4234_v4, %v166_v18  ;;  %v302_v31 = vadd.f32 %v4234_v4, %v167_v22  ;;  %v169_v32 = vmul.f32 %v4228_v2, %v34_v26  ;;  %v38_v42 = vld [vmem:[%s5930_s0 + $0x60] sm:$0xff]  ;;  %v43_v1 = vld [vmem:[%s5930_s0 + $0x88] sm:$0xff]  ;;  %v44_v3 = vld [vmem:[%s5930_s0 + $0x90] sm:$0xff] }
   0x8   :  { %v424_v19 = vmax.f32 %v296_v12, 0.0  ;;  %v300_v21 = vadd.f32 %v4234_v4, %v165_v14  ;;  %v425_v24 = vmax.f32 %v297_v16, 0.0  ;;  %v426_v25 = vmax.f32 %v298_v17, 0.0  ;;  %v42_v58 = vld [vmem:[%s5930_s0 + $0x80] sm:$0xff]  ;;  %v45_v11 = vld [vmem:[%s5930_s0 + $0x98] sm:$0xff] }
   0x9   :  { %v427_v27 = vmax.f32 %v299_v20, 0.0  ;;  %v429_v35 = vmax.f32 %v301_v28, 0.0  ;;  %v303_v36 = vadd.f32 %v4234_v4, %v168_v29  ;;  %v430_v38 = vmax.f32 %v302_v31, 0.0  ;;  %v46_v12 = vld [vmem:[%s5930_s0 + $0xa0] sm:$0xff]  ;;  %v48_v20 = vld [vmem:[%s5930_s0 + $0xb0] sm:$0xff] }
   0xa   :  { %3789 = vmatprep.mubr.msk.f32.mxu0 %vm553_vm0, %v424_v19  ;;  %v428_v30 = vmax.f32 %v300_v21, 0.0  ;;  %v304_v39 = vadd.f32 %v4234_v4, %v169_v32  ;;  %v171_v40 = vmul.f32 %v4228_v2, %v36_v34  ;;  %v305_v44 = vadd.f32 %v4234_v4, %v170_v37  ;;  %v47_v19 = vld [vmem:[%s5930_s0 + $0xa8] sm:$0xff]  ;;  %v50_v28 = vld [vmem:[%s5930_s0 + $0xc0] sm:$0xff] }
   0xb   :  { %3790 = vmatmul.mubr.msk.f32.vlgmr.msra.gmra.mxu0 %vm553_vm0, %v425_v24  ;;  %v431_v43 = vmax.f32 %v303_v36, 0.0  ;;  %v172_v45 = vmul.f32 %v4228_v2, %v37_v41  ;;  %v173_v48 = vmul.f32 %v4228_v2, %v38_v42  ;;  %v174_v53 = vmul.f32 %v4228_v2, %v39_v49  ;;  %v52_v36 = vld [vmem:[%s5930_s0 + $0xd0] sm:$0xff] }
   0xc   :  { %3792 = vmatprep.mubr.msk.f32.mxu0 %vm553_vm0, %v426_v25  ;;  %v432_v46 = vmax.f32 %v304_v39, 0.0  ;;  %v306_v47 = vadd.f32 %v4234_v4, %v171_v40  ;;  %v433_v51 = vmax.f32 %v305_v44, 0.0  ;;  %v175_v56 = vmul.f32 %v4228_v2, %v40_v50  ;;  %v54_v44 = vld [vmem:[%s5930_s0 + $0xe0] sm:$0xff] }
   0xd   :  { %v307_v52 = vadd.f32 %v4234_v4, %v172_v45  ;;  %v308_v55 = vadd.f32 %v4234_v4, %v173_v48  ;;  %v309_v60 = vadd.f32 %v4234_v4, %v174_v53  ;;  %v176_v61 = vmul.f32 %v4228_v2, %v41_v57 }
   0xe   :  { %v434_v54 = vmax.f32 %v306_v47, 0.0  ;;  %v310_v63 = vadd.f32 %v4234_v4, %v175_v56  ;;  %v177_v0 = vmul.f32 %v4228_v2, %v42_v58  ;;  %v178_v7 = vmul.f32 %v4228_v2, %v43_v1 }
   0xf   :  { %3793 = vmatmul.mubr.msk.f32.gmra.mxu0 %vm553_vm0, %v427_v27  ;;  %v435_v59 = vmax.f32 %v307_v52, 0.0  ;;  %v436_v62 = vmax.f32 %v308_v55, 0.0  ;;  %v437_v5 = vmax.f32 %v309_v60, 0.0  ;;  %v311_v6 = vadd.f32 %v4234_v4, %v176_v61  ;;  %v49_v27 = vld [vmem:[%s5930_s0 + $0xb8] sm:$0xff]  ;;  %v56_v52 = vld [vmem:[%s5930_s0 + $0xf0] sm:$0xff]  ;;  %v58_v60 = vld [vmem:[%s5930_s0 + $0x100] sm:$0xff] }
  0x10   :  { %3795 = vmatprep.mubr.msk.f32.mxu0 %vm553_vm0, %v428_v30  ;;  %v438_v8 = vmax.f32 %v310_v63, 0.0  ;;  %v312_v9 = vadd.f32 %v4234_v4, %v177_v0  ;;  %v179_v10 = vmul.f32 %v4228_v2, %v44_v3  ;;  %v313_v14 = vadd.f32 %v4234_v4, %v178_v7 }
  0x11   :  { %v439_v13 = vmax.f32 %v311_v6, 0.0  ;;  %v180_v15 = vmul.f32 %v4228_v2, %v45_v11  ;;  %v181_v18 = vmul.f32 %v4228_v2, %v46_v12  ;;  %v182_v23 = vmul.f32 %v4228_v2, %v47_v19  ;;  %v60_v6 = vld [vmem:[%s5930_s0 + $0x110] sm:$0xff] }
  0x12   :  { %v440_v16 = vmax.f32 %v312_v9, 0.0  ;;  %v314_v17 = vadd.f32 %v4234_v4, %v179_v10  ;;  %v441_v21 = vmax.f32 %v313_v14, 0.0  ;;  %v183_v26 = vmul.f32 %v4228_v2, %v48_v20  ;;  %v62_v14 = vld [vmem:[%s5930_s0 + $0x120] sm:$0xff] }
  0x13   :  { %3796 = vmatmul.mubr.msk.f32.gmra.mxu0 %vm553_vm0, %v429_v35  ;;  %v315_v22 = vadd.f32 %v4234_v4, %v180_v15  ;;  %v316_v25 = vadd.f32 %v4234_v4, %v181_v18  ;;  %v317_v30 = vadd.f32 %v4234_v4, %v182_v23  ;;  %v184_v31 = vmul.f32 %v4228_v2, %v49_v27  ;;  %v51_v35 = vld [vmem:[%s5930_s0 + $0xc8] sm:$0xff] }
  0x14   :  { %3798 = vmatprep.mubr.msk.f32.mxu0 %vm553_vm0, %v430_v38  ;;  %v442_v24 = vmax.f32 %v314_v17, 0.0  ;;  %v318_v33 = vadd.f32 %v4234_v4, %v183_v26  ;;  %v185_v34 = vmul.f32 %v4228_v2, %v50_v28  ;;  %v186_v39 = vmul.f32 %v4228_v2, %v51_v35 }
  0x15   :  { %v443_v29 = vmax.f32 %v315_v22, 0.0  ;;  %v444_v32 = vmax.f32 %v316_v25, 0.0  ;;  %v445_v37 = vmax.f32 %v317_v30, 0.0  ;;  %v319_v38 = vadd.f32 %v4234_v4, %v184_v31  ;;  %v64_v22 = vld [vmem:[%s5930_s0 + $0x130] sm:$0xff]  ;;  %v66_v30 = vld [vmem:[%s5930_s0 + $0x140] sm:$0xff] }
  0x16   :  { %v446_v40 = vmax.f32 %v318_v33, 0.0  ;;  %v320_v41 = vadd.f32 %v4234_v4, %v185_v34  ;;  %v187_v42 = vmul.f32 %v4228_v2, %v52_v36  ;;  %v189_v50 = vmul.f32 %v4228_v2, %v54_v44 }
  0x17   :  { %3799 = vmatmul.mubr.msk.f32.gmra.mxu0 %vm553_vm0, %v431_v43  ;;  %v53_v43 = vld [vmem:[%s5930_s0 + $0xd8] sm:$0xff]  ;;  %v447_v45 = vmax.f32 %v319_v38, 0.0  ;;  %v191_v58 = vmul.f32 %v4228_v2, %v56_v52  ;;  %v193_v3 = vmul.f32 %v4228_v2, %v58_v60  ;;  %v195_v12 = vmul.f32 %v4228_v2, %v60_v6  ;;  %v68_v38 = vld [vmem:[%s5930_s0 + $0x150] sm:$0xff] }
  0x18   :  { %3801 = vmatprep.mubr.msk.f32.mxu0 %vm553_vm0, %v432_v46  ;;  %v321_v46 = vadd.f32 %v4234_v4, %v186_v39  ;;  %v188_v47 = vmul.f32 %v4228_v2, %v53_v43  ;;  %v448_v48 = vmax.f32 %v320_v41, 0.0  ;;  %v322_v49 = vadd.f32 %v4234_v4, %v187_v42 }
  0x19   :  { %v324_v57 = vadd.f32 %v4234_v4, %v189_v50  ;;  %v326_v1 = vadd.f32 %v4234_v4, %v191_v58  ;;  %v328_v11 = vadd.f32 %v4234_v4, %v193_v3  ;;  %v330_v19 = vadd.f32 %v4234_v4, %v195_v12 }
  0x1a   :  { %v449_v53 = vmax.f32 %v321_v46, 0.0  ;;  %v450_v56 = vmax.f32 %v322_v49, 0.0  ;;  %v197_v20 = vmul.f32 %v4228_v2, %v62_v14  ;;  %v199_v28 = vmul.f32 %v4228_v2, %v64_v22  ;;  %v70_v46 = vld [vmem:[%s5930_s0 + $0x160] sm:$0xff] }
  0x1b   :  { %3802 = vmatmul.mubr.msk.f32.gmra.mxu0 %vm553_vm0, %v433_v51  ;;  %v55_v51 = vld [vmem:[%s5930_s0 + $0xe8] sm:$0xff]  ;;  %v452_v0 = vmax.f32 %v324_v57, 0.0  ;;  %v454_v10 = vmax.f32 %v326_v1, 0.0  ;;  %v456_v18 = vmax.f32 %v328_v11, 0.0  ;;  %v458_v26 = vmax.f32 %v330_v19, 0.0 }
  0x1c   :  { %3804 = vmatprep.mubr.msk.f32.mxu0 %vm553_vm0, %v434_v54  ;;  %v323_v54 = vadd.f32 %v4234_v4, %v188_v47  ;;  %v190_v55 = vmul.f32 %v4228_v2, %v55_v51  ;;  %v332_v27 = vadd.f32 %v4234_v4, %v197_v20  ;;  %v334_v35 = vadd.f32 %v4234_v4, %v199_v28  ;;  %v2041_v47 = vld [vmem:[%s5933_s6] sm:$0x3] }
  0x1d   :  { %v201_v36 = vmul.f32 %v4228_v2, %v66_v30  ;;  %v203_v44 = vmul.f32 %v4228_v2, %v68_v38  ;;  %3981 = vmatprep.subr.msk.mxu1 %vm2427_vm1, %v2041_v47 }
  0x1e   :  { %v451_v61 = vmax.f32 %v323_v54, 0.0  ;;  %v460_v34 = vmax.f32 %v332_v27, 0.0  ;;  %v462_v42 = vmax.f32 %v334_v35, 0.0  ;;  %v71_v54 = vld [vmem:[%s5930_s0 + $0x168] sm:$0xff]  ;;  %3982 = vmatpush3.msk.msra.mxu1 %vm2427_vm1, %v2041_v47 }
  0x1f   :  { %3805 = vmatmul.mubr.msk.f32.gmra.mxu0 %vm553_vm0, %v435_v59  ;;  %v57_v59 = vld [vmem:[%s5930_s0 + $0xf8] sm:$0xff]  ;;  %v336_v43 = vadd.f32 %v4234_v4, %v201_v36  ;;  %v338_v52 = vadd.f32 %v4234_v4, %v203_v44  ;;  %v206_v58 = vmul.f32 %v4228_v2, %v71_v54 }
  0x20   :  { %3807 = vmatprep.mubr.msk.f32.mxu0 %vm553_vm0, %v436_v62  ;;  %v325_v62 = vadd.f32 %v4234_v4, %v190_v55  ;;  %v192_v63 = vmul.f32 %v4228_v2, %v57_v59  ;;  %v72_v55 = vld [vmem:[%s5930_s0 + $0x170] sm:$0xff] }
  0x21   :  { %v464_v51 = vmax.f32 %v336_v43, 0.0  ;;  %v466_v59 = vmax.f32 %v338_v52, 0.0  ;;  %v341_v1 = vadd.f32 %v4234_v4, %v206_v58 }
  0x22   :  { %v453_v7 = vmax.f32 %v325_v62, 0.0  ;;  %v73_v62 = vld [vmem:[%s5930_s0 + $0x178] sm:$0xff] }
  0x23   :  { %3808 = vmatmul.mubr.msk.f32.gmra.mxu0 %vm553_vm0, %v437_v5  ;;  %v59_v5 = vld [vmem:[%s5930_s0 + $0x108] sm:$0xff]  ;;  %v208_v3 = vmul.f32 %v4228_v2, %v73_v62 }
  0x24   :  { %3810 = vmatprep.mubr.msk.f32.mxu0 %vm553_vm0, %v438_v8  ;;  %v327_v8 = vadd.f32 %v4234_v4, %v192_v63  ;;  %v194_v9 = vmul.f32 %v4228_v2, %v59_v5  ;;  %v74_v63 = vld [vmem:[%s5930_s0 + $0x180] sm:$0xff] }
  0x25   :  { %v343_v11 = vadd.f32 %v4234_v4, %v208_v3 }
  0x26   :  { %v455_v15 = vmax.f32 %v327_v8, 0.0  ;;  %v75_v8 = vld [vmem:[%s5930_s0 + $0x188] sm:$0xff] }
  0x27   :  { %3811 = vmatmul.mubr.msk.f32.gmra.mxu0 %vm553_vm0, %v439_v13  ;;  %v61_v13 = vld [vmem:[%s5930_s0 + $0x118] sm:$0xff]  ;;  %v210_v12 = vmul.f32 %v4228_v2, %v75_v8 }
  0x28   :  { %3813 = vmatprep.mubr.msk.f32.mxu0 %vm553_vm0, %v440_v16  ;;  %v329_v16 = vadd.f32 %v4234_v4, %v194_v9  ;;  %v196_v17 = vmul.f32 %v4228_v2, %v61_v13  ;;  %v76_v9 = vld [vmem:[%s5930_s0 + $0x190] sm:$0xff] }
  0x29   :  { %v345_v19 = vadd.f32 %v4234_v4, %v210_v12 }
  0x2a   :  { %v457_v23 = vmax.f32 %v329_v16, 0.0  ;;  %v77_v16 = vld [vmem:[%s5930_s0 + $0x198] sm:$0xff] }
  0x2b   :  { %3814 = vmatmul.mubr.msk.f32.gmra.mxu0 %vm553_vm0, %v441_v21  ;;  %v63_v21 = vld [vmem:[%s5930_s0 + $0x128] sm:$0xff]  ;;  %v212_v20 = vmul.f32 %v4228_v2, %v77_v16 }
  0x2c   :  { %3816 = vmatprep.mubr.msk.f32.mxu0 %vm553_vm0, %v442_v24  ;;  %v331_v24 = vadd.f32 %v4234_v4, %v196_v17  ;;  %v198_v25 = vmul.f32 %v4228_v2, %v63_v21  ;;  %v78_v17 = vld [vmem:[%s5930_s0 + $0x1a0] sm:$0xff] }
  0x2d   :  { %v347_v27 = vadd.f32 %v4234_v4, %v212_v20 }
  0x2e   :  { %v459_v31 = vmax.f32 %v331_v24, 0.0  ;;  %v79_v24 = vld [vmem:[%s5930_s0 + $0x1a8] sm:$0xff] }
  0x2f   :  { %3817 = vmatmul.mubr.msk.f32.gmra.mxu0 %vm553_vm0, %v443_v29  ;;  %v65_v29 = vld [vmem:[%s5930_s0 + $0x138] sm:$0xff]  ;;  %v214_v28 = vmul.f32 %v4228_v2, %v79_v24 }
  0x30   :  { %3819 = vmatprep.mubr.msk.f32.mxu0 %vm553_vm0, %v444_v32  ;;  %v333_v32 = vadd.f32 %v4234_v4, %v198_v25  ;;  %v200_v33 = vmul.f32 %v4228_v2, %v65_v29  ;;  %v80_v25 = vld [vmem:[%s5930_s0 + $0x1b0] sm:$0xff] }
  0x31   :  { %v349_v35 = vadd.f32 %v4234_v4, %v214_v28 }
  0x32   :  { %v461_v39 = vmax.f32 %v333_v32, 0.0  ;;  %v81_v32 = vld [vmem:[%s5930_s0 + $0x1b8] sm:$0xff] }
  0x33   :  { %3820 = vmatmul.mubr.msk.f32.gmra.mxu0 %vm553_vm0, %v445_v37  ;;  %v67_v37 = vld [vmem:[%s5930_s0 + $0x148] sm:$0xff]  ;;  %v216_v36 = vmul.f32 %v4228_v2, %v81_v32 }
  0x34   :  { %3822 = vmatprep.mubr.msk.f32.mxu0 %vm553_vm0, %v446_v40  ;;  %v335_v40 = vadd.f32 %v4234_v4, %v200_v33  ;;  %v202_v41 = vmul.f32 %v4228_v2, %v67_v37  ;;  %v82_v33 = vld [vmem:[%s5930_s0 + $0x1c0] sm:$0xff] }
  0x35   :  { %v351_v43 = vadd.f32 %v4234_v4, %v216_v36 }
  0x36   :  { %v337_v49 = vadd.f32 %v4234_v4, %v202_v41  ;;  %v84_v41 = vld [vmem:[%s5930_s0 + $0x1d0] sm:$0xff] }
  0x37   :  { %3823 = vmatmul.mubr.msk.f32.gmra.mxu0 %vm553_vm0, %v447_v45  ;;  %v69_v45 = vld [vmem:[%s5930_s0 + $0x158] sm:$0xff]  ;;  %v219_v47 = vmul.f32 %v4228_v2, %v84_v41 }
  0x38   :  { %3825 = vmatprep.mubr.msk.f32.mxu0 %vm553_vm0, %v448_v48  ;;  %v463_v48 = vmax.f32 %v335_v40, 0.0  ;;  %v204_v50 = vmul.f32 %v4228_v2, %v69_v45  ;;  %v83_v40 = vld [vmem:[%s5930_s0 + $0x1c8] sm:$0xff] }
  0x39   :  { %v218_v44 = vmul.f32 %v4228_v2, %v83_v40  ;;  %v354_v54 = vadd.f32 %v4234_v4, %v219_v47 }
  0x3a   :  { %v339_v57 = vadd.f32 %v4234_v4, %v204_v50  ;;  %v479_v50 = vmax.f32 %v351_v43, 0.0  ;;  %v100_v43 = vld [vmem:[%s5930_s0 + $0x250] sm:$0xff] }
  0x3b   :  { %3826 = vmatmul.mubr.msk.f32.gmra.mxu0 %vm553_vm0, %v449_v53  ;;  %v205_v53 = vmul.f32 %v4228_v2, %v70_v46 }
  0x3c   :  { %3828 = vmatprep.mubr.msk.f32.mxu0 %vm553_vm0, %v450_v56  ;;  %v465_v56 = vmax.f32 %v337_v49, 0.0  ;;  %v86_v49 = vld [vmem:[%s5930_s0 + $0x1e0] sm:$0xff] }
  0x3d   :  { %v340_v60 = vadd.f32 %v4234_v4, %v205_v53 }
  0x3f   :  { %3829 = vmatmul.mubr.msk.f32.gmra.mxu0 %vm553_vm0, %v451_v61  ;;  %v207_v61 = vmul.f32 %v4228_v2, %v72_v55  ;;  %v468_v5 = vmax.f32 %v340_v60, 0.0  ;;  %v221_v55 = vmul.f32 %v4228_v2, %v86_v49  ;;  %v235_v49 = vmul.f32 %v4228_v2, %v100_v43 }
  0x40   :  { %3831 = vmatprep.mubr.msk.f32.mxu0 %vm553_vm0, %v452_v0  ;;  %v467_v0 = vmax.f32 %v339_v57, 0.0  ;;  %v88_v57 = vld [vmem:[%s5930_s0 + $0x1f0] sm:$0xff] }
  0x41   :  { %v342_v6 = vadd.f32 %v4234_v4, %v207_v61  ;;  %v482_v61 = vmax.f32 %v354_v54, 0.0  ;;  %v356_v62 = vadd.f32 %v4234_v4, %v221_v55 }
  0x43   :  { %3832 = vmatmul.mubr.msk.f32.gmra.mxu0 %vm553_vm0, %v453_v7  ;;  %v209_v7 = vmul.f32 %v4228_v2, %v74_v63  ;;  %v470_v13 = vmax.f32 %v342_v6, 0.0  ;;  %v223_v63 = vmul.f32 %v4228_v2, %v88_v57 }
  0x44   :  { %3834 = vmatprep.mubr.msk.f32.mxu0 %vm553_vm0, %v454_v10  ;;  %v469_v10 = vmax.f32 %v341_v1, 0.0  ;;  %v90_v1 = vld [vmem:[%s5930_s0 + $0x200] sm:$0xff] }
  0x45   :  { %v344_v14 = vadd.f32 %v4234_v4, %v209_v7  ;;  %v484_v7 = vmax.f32 %v356_v62, 0.0  ;;  %v358_v8 = vadd.f32 %v4234_v4, %v223_v63 }
  0x47   :  { %3835 = vmatmul.mubr.msk.f32.gmra.mxu0 %vm553_vm0, %v455_v15  ;;  %v211_v15 = vmul.f32 %v4228_v2, %v76_v9  ;;  %v472_v21 = vmax.f32 %v344_v14, 0.0  ;;  %v225_v9 = vmul.f32 %v4228_v2, %v90_v1 }
  0x48   :  { %3837 = vmatprep.mubr.msk.f32.mxu0 %vm553_vm0, %v456_v18  ;;  %v471_v18 = vmax.f32 %v343_v11, 0.0  ;;  %v92_v11 = vld [vmem:[%s5930_s0 + $0x210] sm:$0xff] }
  0x49   :  { %v346_v22 = vadd.f32 %v4234_v4, %v211_v15  ;;  %v486_v15 = vmax.f32 %v358_v8, 0.0  ;;  %v360_v16 = vadd.f32 %v4234_v4, %v225_v9 }
  0x4b   :  { %3838 = vmatmul.mubr.msk.f32.gmra.mxu0 %vm553_vm0, %v457_v23  ;;  %v213_v23 = vmul.f32 %v4228_v2, %v78_v17  ;;  %v474_v29 = vmax.f32 %v346_v22, 0.0  ;;  %v227_v17 = vmul.f32 %v4228_v2, %v92_v11 }
  0x4c   :  { %3840 = vmatprep.mubr.msk.f32.mxu0 %vm553_vm0, %v458_v26  ;;  %v473_v26 = vmax.f32 %v345_v19, 0.0  ;;  %v94_v19 = vld [vmem:[%s5930_s0 + $0x220] sm:$0xff] }
  0x4d   :  { %v348_v30 = vadd.f32 %v4234_v4, %v213_v23  ;;  %v488_v23 = vmax.f32 %v360_v16, 0.0  ;;  %v362_v24 = vadd.f32 %v4234_v4, %v227_v17 }
  0x4f   :  { %3841 = vmatmul.mubr.msk.f32.gmra.mxu0 %vm553_vm0, %v459_v31  ;;  %v215_v31 = vmul.f32 %v4228_v2, %v80_v25  ;;  %v476_v37 = vmax.f32 %v348_v30, 0.0  ;;  %v229_v25 = vmul.f32 %v4228_v2, %v94_v19 }
  0x50   :  { %3843 = vmatprep.mubr.msk.f32.mxu0 %vm553_vm0, %v460_v34  ;;  %v475_v34 = vmax.f32 %v347_v27, 0.0  ;;  %v96_v27 = vld [vmem:[%s5930_s0 + $0x230] sm:$0xff] }
  0x51   :  { %v350_v38 = vadd.f32 %v4234_v4, %v215_v31  ;;  %v490_v31 = vmax.f32 %v362_v24, 0.0  ;;  %v364_v32 = vadd.f32 %v4234_v4, %v229_v25 }
  0x53   :  { %3844 = vmatmul.mubr.msk.f32.gmra.mxu0 %vm553_vm0, %v461_v39  ;;  %v217_v39 = vmul.f32 %v4228_v2, %v82_v33  ;;  %v478_v45 = vmax.f32 %v350_v38, 0.0  ;;  %v231_v33 = vmul.f32 %v4228_v2, %v96_v27 }
  0x54   :  { %3846 = vmatprep.mubr.msk.f32.mxu0 %vm553_vm0, %v462_v42  ;;  %v477_v42 = vmax.f32 %v349_v35, 0.0  ;;  %v98_v35 = vld [vmem:[%s5930_s0 + $0x240] sm:$0xff] }
  0x55   :  { %v352_v46 = vadd.f32 %v4234_v4, %v217_v39  ;;  %v492_v39 = vmax.f32 %v364_v32, 0.0  ;;  %v366_v40 = vadd.f32 %v4234_v4, %v231_v33  ;;  %v233_v41 = vmul.f32 %v4228_v2, %v98_v35 }
  0x57   :  { %3847 = vmatmul.mubr.msk.f32.gmra.mxu0 %vm553_vm0, %v463_v48  ;;  %v85_v48 = vld [vmem:[%s5930_s0 + $0x1d8] sm:$0xff]  ;;  %v480_v53 = vmax.f32 %v352_v46, 0.0  ;;  %v494_v47 = vmax.f32 %v366_v40, 0.0 }
  0x58   :  { %3849 = vmatprep.mubr.msk.f32.mxu0 %vm553_vm0, %v464_v51  ;;  %v353_v51 = vadd.f32 %v4234_v4, %v218_v44  ;;  %v220_v52 = vmul.f32 %v4228_v2, %v85_v48  ;;  %v368_v48 = vadd.f32 %v4234_v4, %v233_v41 }
  0x5a   :  { %v481_v58 = vmax.f32 %v353_v51, 0.0  ;;  %v102_v51 = vld [vmem:[%s5930_s0 + $0x260] sm:$0xff]  ;;  %v496_v55 = vmax.f32 %v368_v48, 0.0 }
  0x5b   :  { %3850 = vmatmul.mubr.msk.f32.gmra.mxu0 %vm553_vm0, %v465_v56  ;;  %v87_v56 = vld [vmem:[%s5930_s0 + $0x1e8] sm:$0xff]  ;;  %v237_v57 = vmul.f32 %v4228_v2, %v102_v51 }
  0x5c   :  { %3852 = vmatprep.mubr.msk.f32.mxu0 %vm553_vm0, %v466_v59  ;;  %v355_v59 = vadd.f32 %v4234_v4, %v220_v52  ;;  %v222_v60 = vmul.f32 %v4228_v2, %v87_v56  ;;  %v370_v56 = vadd.f32 %v4234_v4, %v235_v49 }
  0x5e   :  { %v483_v3 = vmax.f32 %v355_v59, 0.0  ;;  %v104_v59 = vld [vmem:[%s5930_s0 + $0x270] sm:$0xff]  ;;  %v498_v63 = vmax.f32 %v370_v56, 0.0 }
  0x5f   :  { %3853 = vmatmul.mubr.msk.f32.gmra.mxu0 %vm553_vm0, %v467_v0  ;;  %v89_v0 = vld [vmem:[%s5930_s0 + $0x1f8] sm:$0xff]  ;;  %v239_v1 = vmul.f32 %v4228_v2, %v104_v59 }
  0x60   :  { %3855 = vmatprep.mubr.msk.f32.mxu0 %vm553_vm0, %v468_v5  ;;  %v357_v5 = vadd.f32 %v4234_v4, %v222_v60  ;;  %v224_v6 = vmul.f32 %v4228_v2, %v89_v0  ;;  %v372_v0 = vadd.f32 %v4234_v4, %v237_v57 }
  0x62   :  { %v485_v12 = vmax.f32 %v357_v5, 0.0  ;;  %v106_v5 = vld [vmem:[%s5930_s0 + $0x280] sm:$0xff]  ;;  %v500_v9 = vmax.f32 %v372_v0, 0.0 }
  0x63   :  { %3856 = vmatmul.mubr.msk.f32.gmra.mxu0 %vm553_vm0, %v469_v10  ;;  %v91_v10 = vld [vmem:[%s5930_s0 + $0x208] sm:$0xff]  ;;  %v241_v11 = vmul.f32 %v4228_v2, %v106_v5 }
  0x64   :  { %3858 = vmatprep.mubr.msk.f32.mxu0 %vm553_vm0, %v470_v13  ;;  %v359_v13 = vadd.f32 %v4234_v4, %v224_v6  ;;  %v226_v14 = vmul.f32 %v4228_v2, %v91_v10  ;;  %v374_v10 = vadd.f32 %v4234_v4, %v239_v1 }
  0x66   :  { %v487_v20 = vmax.f32 %v359_v13, 0.0  ;;  %v108_v13 = vld [vmem:[%s5930_s0 + $0x290] sm:$0xff]  ;;  %v502_v17 = vmax.f32 %v374_v10, 0.0 }
  0x67   :  { %3859 = vmatmul.mubr.msk.f32.gmra.mxu0 %vm553_vm0, %v471_v18  ;;  %v93_v18 = vld [vmem:[%s5930_s0 + $0x218] sm:$0xff]  ;;  %v243_v19 = vmul.f32 %v4228_v2, %v108_v13 }
  0x68   :  { %3861 = vmatprep.mubr.msk.f32.mxu0 %vm553_vm0, %v472_v21  ;;  %v361_v21 = vadd.f32 %v4234_v4, %v226_v14  ;;  %v228_v22 = vmul.f32 %v4228_v2, %v93_v18  ;;  %v376_v18 = vadd.f32 %v4234_v4, %v241_v11 }
  0x6a   :  { %v489_v28 = vmax.f32 %v361_v21, 0.0  ;;  %v110_v21 = vld [vmem:[%s5930_s0 + $0x2a0] sm:$0xff]  ;;  %v504_v25 = vmax.f32 %v376_v18, 0.0 }
  0x6b   :  { %3862 = vmatmul.mubr.msk.f32.gmra.mxu0 %vm553_vm0, %v473_v26  ;;  %v95_v26 = vld [vmem:[%s5930_s0 + $0x228] sm:$0xff]  ;;  %v245_v27 = vmul.f32 %v4228_v2, %v110_v21 }
  0x6c   :  { %3864 = vmatprep.mubr.msk.f32.mxu0 %vm553_vm0, %v474_v29  ;;  %v363_v29 = vadd.f32 %v4234_v4, %v228_v22  ;;  %v230_v30 = vmul.f32 %v4228_v2, %v95_v26  ;;  %v378_v26 = vadd.f32 %v4234_v4, %v243_v19 }
  0x6e   :  { %v491_v36 = vmax.f32 %v363_v29, 0.0  ;;  %v112_v29 = vld [vmem:[%s5930_s0 + $0x2b0] sm:$0xff]  ;;  %v506_v33 = vmax.f32 %v378_v26, 0.0 }
  0x6f   :  { %3865 = vmatmul.mubr.msk.f32.gmra.mxu0 %vm553_vm0, %v475_v34  ;;  %v97_v34 = vld [vmem:[%s5930_s0 + $0x238] sm:$0xff]  ;;  %v247_v35 = vmul.f32 %v4228_v2, %v112_v29 }
  0x70   :  { %3867 = vmatprep.mubr.msk.f32.mxu0 %vm553_vm0, %v476_v37  ;;  %v365_v37 = vadd.f32 %v4234_v4, %v230_v30  ;;  %v232_v38 = vmul.f32 %v4228_v2, %v97_v34  ;;  %v380_v34 = vadd.f32 %v4234_v4, %v245_v27 }
  0x72   :  { %v493_v44 = vmax.f32 %v365_v37, 0.0  ;;  %v114_v37 = vld [vmem:[%s5930_s0 + $0x2c0] sm:$0xff]  ;;  %v508_v41 = vmax.f32 %v380_v34, 0.0 }
  0x73   :  { %3868 = vmatmul.mubr.msk.f32.gmra.mxu0 %vm553_vm0, %v477_v42  ;;  %v99_v42 = vld [vmem:[%s5930_s0 + $0x248] sm:$0xff]  ;;  %v249_v43 = vmul.f32 %v4228_v2, %v114_v37 }
  0x74   :  { %3870 = vmatprep.mubr.msk.f32.mxu0 %vm553_vm0, %v478_v45  ;;  %v367_v45 = vadd.f32 %v4234_v4, %v232_v38  ;;  %v234_v46 = vmul.f32 %v4228_v2, %v99_v42  ;;  %v382_v42 = vadd.f32 %v4234_v4, %v247_v35 }
  0x76   :  { %v495_v52 = vmax.f32 %v367_v45, 0.0  ;;  %v116_v45 = vld [vmem:[%s5930_s0 + $0x2d0] sm:$0xff]  ;;  %v510_v49 = vmax.f32 %v382_v42, 0.0 }
  0x77   :  { %3871 = vmatmul.mubr.msk.f32.gmra.mxu0 %vm553_vm0, %v479_v50  ;;  %v101_v50 = vld [vmem:[%s5930_s0 + $0x258] sm:$0xff]  ;;  %v251_v51 = vmul.f32 %v4228_v2, %v116_v45 }
  0x78   :  { %3873 = vmatprep.mubr.msk.f32.mxu0 %vm553_vm0, %v480_v53  ;;  %v369_v53 = vadd.f32 %v4234_v4, %v234_v46  ;;  %v236_v54 = vmul.f32 %v4228_v2, %v101_v50  ;;  %v384_v50 = vadd.f32 %v4234_v4, %v249_v43  ;;  %v4866_v43 = vld [vmem:[%s5932_s2] ss:$0 sm:$0xff] }
  0x7a   :  { %v497_v60 = vmax.f32 %v369_v53, 0.0  ;;  %v118_v53 = vld [vmem:[%s5930_s0 + $0x2e0] sm:$0xff]  ;;  %v512_v57 = vmax.f32 %v384_v50, 0.0 }
  0x7b   :  { %3874 = vmatmul.mubr.msk.f32.gmra.mxu0 %vm553_vm0, %v481_v58  ;;  %v103_v58 = vld [vmem:[%s5930_s0 + $0x268] sm:$0xff]  ;;  %v253_v59 = vmul.f32 %v4228_v2, %v118_v53 }
  0x7c   :  { %3876 = vmatprep.mubr.msk.f32.mxu0 %vm553_vm0, %v482_v61  ;;  %v371_v61 = vadd.f32 %v4234_v4, %v236_v54  ;;  %v238_v62 = vmul.f32 %v4228_v2, %v103_v58  ;;  %v386_v58 = vadd.f32 %v4234_v4, %v251_v51 }
  0x7e   :  { %v499_v6 = vmax.f32 %v371_v61, 0.0  ;;  %v120_v61 = vld [vmem:[%s5930_s0 + $0x2f0] sm:$0xff]  ;;  %v514_v1 = vmax.f32 %v386_v58, 0.0 }
  0x7f   :  { %3877 = vmatmul.mubr.msk.f32.gmra.mxu0 %vm553_vm0, %v483_v3  ;;  %v105_v3 = vld [vmem:[%s5930_s0 + $0x278] sm:$0xff]  ;;  %v255_v5 = vmul.f32 %v4228_v2, %v120_v61 }
  0x80   :  { %3879 = vmatprep.mubr.msk.f32.mxu0 %vm553_vm0, %v484_v7  ;;  %v373_v7 = vadd.f32 %v4234_v4, %v238_v62  ;;  %v240_v8 = vmul.f32 %v4228_v2, %v105_v3  ;;  %v388_v3 = vadd.f32 %v4234_v4, %v253_v59 }
  0x82   :  { %v501_v14 = vmax.f32 %v373_v7, 0.0  ;;  %v122_v7 = vld [vmem:[%s5930_s0 + $0x300] sm:$0xff]  ;;  %v516_v11 = vmax.f32 %v388_v3, 0.0 }
  0x83   :  { %3880 = vmatmul.mubr.msk.f32.gmra.mxu0 %vm553_vm0, %v485_v12  ;;  %v107_v12 = vld [vmem:[%s5930_s0 + $0x288] sm:$0xff]  ;;  %v257_v13 = vmul.f32 %v4228_v2, %v122_v7 }
  0x84   :  { %3882 = vmatprep.mubr.msk.f32.mxu0 %vm553_vm0, %v486_v15  ;;  %v375_v15 = vadd.f32 %v4234_v4, %v240_v8  ;;  %v242_v16 = vmul.f32 %v4228_v2, %v107_v12  ;;  %v390_v12 = vadd.f32 %v4234_v4, %v255_v5 }
  0x86   :  { %v503_v22 = vmax.f32 %v375_v15, 0.0  ;;  %v124_v15 = vld [vmem:[%s5930_s0 + $0x310] sm:$0xff]  ;;  %v518_v19 = vmax.f32 %v390_v12, 0.0 }
  0x87   :  { %3883 = vmatmul.mubr.msk.f32.gmra.mxu0 %vm553_vm0, %v487_v20  ;;  %v109_v20 = vld [vmem:[%s5930_s0 + $0x298] sm:$0xff]  ;;  %v259_v21 = vmul.f32 %v4228_v2, %v124_v15 }
  0x88   :  { %3885 = vmatprep.mubr.msk.f32.mxu0 %vm553_vm0, %v488_v23  ;;  %v377_v23 = vadd.f32 %v4234_v4, %v242_v16  ;;  %v244_v24 = vmul.f32 %v4228_v2, %v109_v20  ;;  %v392_v20 = vadd.f32 %v4234_v4, %v257_v13 }
  0x8a   :  { %v505_v30 = vmax.f32 %v377_v23, 0.0  ;;  %v126_v23 = vld [vmem:[%s5930_s0 + $0x320] sm:$0xff]  ;;  %v520_v27 = vmax.f32 %v392_v20, 0.0  ;;  %v136_v20 = vld [vmem:[%s5930_s0 + $0x370] sm:$0xff] }
  0x8b   :  { %3886 = vmatmul.mubr.msk.f32.gmra.mxu0 %vm553_vm0, %v489_v28  ;;  %v111_v28 = vld [vmem:[%s5930_s0 + $0x2a8] sm:$0xff]  ;;  %v261_v29 = vmul.f32 %v4228_v2, %v126_v23 }
  0x8c   :  { %3888 = vmatprep.mubr.msk.f32.mxu0 %vm553_vm0, %v490_v31  ;;  %v379_v31 = vadd.f32 %v4234_v4, %v244_v24  ;;  %v246_v32 = vmul.f32 %v4228_v2, %v111_v28  ;;  %v394_v28 = vadd.f32 %v4234_v4, %v259_v21 }
  0x8e   :  { %v507_v38 = vmax.f32 %v379_v31, 0.0  ;;  %v128_v31 = vld [vmem:[%s5930_s0 + $0x330] sm:$0xff]  ;;  %v522_v37 = vmax.f32 %v394_v28, 0.0 }
  0x8f   :  { %3889 = vmatmul.mubr.msk.f32.gmra.mxu0 %vm553_vm0, %v491_v36  ;;  %v113_v36 = vld [vmem:[%s5930_s0 + $0x2b8] sm:$0xff]  ;;  %v263_v35 = vmul.f32 %v4228_v2, %v128_v31 }
  0x90   :  { %3891 = vmatprep.mubr.msk.f32.mxu0 %vm553_vm0, %v492_v39  ;;  %v381_v39 = vadd.f32 %v4234_v4, %v246_v32  ;;  %v248_v40 = vmul.f32 %v4228_v2, %v113_v36  ;;  %v129_v36 = vld [vmem:[%s5930_s0 + $0x338] sm:$0xff] }
  0x91   :  { %v398_v45 = vadd.f32 %v4866_v43, %v263_v35  ;;  %v138_v35 = vld [vmem:[%s5930_s0 + $0x380] sm:$0xff] }
  0x92   :  { %v509_v46 = vmax.f32 %v381_v39, 0.0  ;;  %v4851_v39 = vld [vmem:[%s5934_s4] ss:$0 sm:$0xff] }
  0x93   :  { %3892 = vmatmul.mubr.msk.f32.gmra.mxu0 %vm553_vm0, %v493_v44  ;;  %v115_v44 = vld [vmem:[%s5930_s0 + $0x2c8] sm:$0xff]  ;;  %v526_v59 = vmax.f32 %v398_v45, 0.0 }
  0x94   :  { %3894 = vmatprep.mubr.msk.f32.mxu0 %vm553_vm0, %v494_v47  ;;  %v383_v47 = vadd.f32 %v4234_v4, %v248_v40  ;;  %v250_v48 = vmul.f32 %v4228_v2, %v115_v44  ;;  %v130_v40 = vld [vmem:[%s5930_s0 + $0x340] sm:$0xff] }
  0x96   :  { %v511_v54 = vmax.f32 %v383_v47, 0.0 }
  0x97   :  { %3895 = vmatmul.mubr.msk.f32.gmra.mxu0 %vm553_vm0, %v495_v52  ;;  %v117_v52 = vld [vmem:[%s5930_s0 + $0x2d8] sm:$0xff] }
  0x98   :  { %3897 = vmatprep.mubr.msk.f32.mxu0 %vm553_vm0, %v496_v55  ;;  %v385_v55 = vadd.f32 %v4234_v4, %v250_v48  ;;  %v252_v56 = vmul.f32 %v4228_v2, %v117_v52  ;;  %v4877_v48 = vld [vmem:[%s5935_s5] ss:$0 sm:$0xff]  ;;  %v132_v52 = vld [vmem:[%s5930_s0 + $0x350] sm:$0xff] }
  0x9a   :  { %v513_v62 = vmax.f32 %v385_v55, 0.0 }
  0x9b   :  { %3898 = vmatmul.mubr.msk.f32.gmra.mxu0 %vm553_vm0, %v497_v60  ;;  %v119_v60 = vld [vmem:[%s5930_s0 + $0x2e8] sm:$0xff] }
  0x9c   :  { %3900 = vmatprep.mubr.msk.f32.mxu0 %vm553_vm0, %v498_v63  ;;  %v387_v63 = vadd.f32 %v4234_v4, %v252_v56  ;;  %v254_v0 = vmul.f32 %v4228_v2, %v119_v60 }
  0x9e   :  { %v515_v8 = vmax.f32 %v387_v63, 0.0 }
  0x9f   :  { %3901 = vmatmul.mubr.msk.f32.gmra.mxu0 %vm553_vm0, %v499_v6  ;;  %v121_v6 = vld [vmem:[%s5930_s0 + $0x2f8] sm:$0xff] }
  0xa0   :  { %3903 = vmatprep.mubr.msk.f32.mxu0 %vm553_vm0, %v500_v9  ;;  %v389_v9 = vadd.f32 %v4234_v4, %v254_v0  ;;  %v256_v10 = vmul.f32 %v4228_v2, %v121_v6  ;;  %v133_v0 = vld [vmem:[%s5930_s0 + $0x358] sm:$0xff] }
  0xa2   :  { %v517_v16 = vmax.f32 %v389_v9, 0.0 }
  0xa3   :  { %3904 = vmatmul.mubr.msk.f32.gmra.mxu0 %vm553_vm0, %v501_v14  ;;  %v123_v14 = vld [vmem:[%s5930_s0 + $0x308] sm:$0xff] }
  0xa4   :  { %3906 = vmatprep.mubr.msk.f32.mxu0 %vm553_vm0, %v502_v17  ;;  %v391_v17 = vadd.f32 %v4234_v4, %v256_v10  ;;  %v258_v18 = vmul.f32 %v4228_v2, %v123_v14  ;;  %v135_v14 = vld [vmem:[%s5930_s0 + $0x368] sm:$0xff] }
  0xa6   :  { %v519_v24 = vmax.f32 %v391_v17, 0.0 }
  0xa7   :  { %3907 = vmatmul.mubr.msk.f32.gmra.mxu0 %vm553_vm0, %v503_v22  ;;  %v125_v22 = vld [vmem:[%s5930_s0 + $0x318] sm:$0xff] }
  0xa8   :  { %3909 = vmatprep.mubr.msk.f32.mxu0 %vm553_vm0, %v504_v25  ;;  %v393_v25 = vadd.f32 %v4234_v4, %v258_v18  ;;  %v260_v26 = vmul.f32 %v4228_v2, %v125_v22 }
  0xaa   :  { %v521_v32 = vmax.f32 %v393_v25, 0.0 }
  0xab   :  { %3910 = vmatmul.mubr.msk.f32.gmra.mxu0 %vm553_vm0, %v505_v30  ;;  %v127_v30 = vld [vmem:[%s5930_s0 + $0x328] sm:$0xff] }
  0xac   :  { %3912 = vmatprep.mubr.msk.f32.mxu0 %vm553_vm0, %v506_v33  ;;  %v395_v33 = vadd.f32 %v4234_v4, %v260_v26  ;;  %v262_v34 = vmul.f32 %v4228_v2, %v127_v30  ;;  %v4859_v2 = vld [vmem:[%s5931_s1] ss:$0 sm:$0xff]  ;;  %v137_v30 = vld [vmem:[%s5930_s0 + $0x378] sm:$0xff] }
  0xad   :  { %v265_v50 = vmul.f32 %v4859_v2, %v130_v40  ;;  %v267_v63 = vmul.f32 %v4859_v2, %v132_v52  ;;  %v268_v12 = vmul.f32 %v4859_v2, %v133_v0  ;;  %v139_v52 = vld [vmem:[%s5930_s0 + $0x388] sm:$0xff]  ;;  %v141_v0 = vld [vmem:[%s5930_s0 + $0x398] sm:$0xff] }
  0xae   :  { %v397_v44 = vadd.f32 %v4866_v43, %v262_v34  ;;  %v271_v34 = vmul.f32 %v4859_v2, %v136_v20 }
  0xaf   :  { %3913 = vmatmul.mubr.msk.f32.gmra.mxu0 %vm553_vm0, %v507_v38  ;;  %v396_v38 = vadd.f32 %v4234_v4, %v261_v29  ;;  %v523_v4 = vmax.f32 %v395_v33, 0.0  ;;  %v402_v18 = vadd.f32 %v4866_v43, %v267_v63  ;;  %v403_v28 = vadd.f32 %v4866_v43, %v268_v12 }
  0xb0   :  { %3915 = vmatprep.mubr.msk.f32.mxu0 %vm553_vm0, %v508_v41  ;;  %v264_v41 = vmul.f32 %v4859_v2, %v129_v36  ;;  %v525_v58 = vmax.f32 %v397_v44, 0.0  ;;  %v274_v63 = vmul.f32 %v4859_v2, %v139_v52  ;;  %v276_v12 = vmul.f32 %v4859_v2, %v141_v0  ;;  %v147_v52 = vld [vmem:[%s5930_s0 + $0x3c8] sm:$0xff] }
  0xb1   :  { %v530_v33 = vmax.f32 %v402_v18, 0.0  ;;  %v531_v45 = vmax.f32 %v403_v28, 0.0  ;;  %v143_v18 = vld [vmem:[%s5930_s0 + $0x3a8] sm:$0xff] }
  0xb2   :  { %v278_v28 = vmul.f32 %v4859_v2, %v143_v18 }
  0xb3   :  { %3916 = vmatmul.mubr.msk.f32.gmra.mxu0 %vm553_vm0, %v509_v46  ;;  %v131_v46 = vld [vmem:[%s5930_s0 + $0x348] sm:$0xff] }
  0xb4   :  { %3918 = vmatprep.mubr.msk.f32.mxu0 %vm553_vm0, %v510_v49  ;;  %v524_v49 = vmax.f32 %v396_v38, 0.0  ;;  %v266_v55 = vmul.f32 %v4859_v2, %v131_v46  ;;  %v273_v46 = vmul.f32 %v4859_v2, %v138_v35 }
  0xb7   :  { %3919 = vmatmul.mubr.msk.f32.gmra.mxu0 %vm553_vm0, %v511_v54  ;;  %v399_v54 = vadd.f32 %v4866_v43, %v264_v41  ;;  %v272_v41 = vmul.f32 %v4859_v2, %v137_v30 }
  0xb8   :  { %3921 = vmatprep.mubr.msk.f32.mxu0 %vm553_vm0, %v512_v57 }
  0xb9   :  { %v527_v7 = vmax.f32 %v399_v54, 0.0  ;;  %v140_v54 = vld [vmem:[%s5930_s0 + $0x390] sm:$0xff] }
  0xbb   :  { %3922 = vmatmul.mubr.msk.f32.gmra.mxu0 %vm553_vm0, %v513_v62  ;;  %v400_v62 = vadd.f32 %v4866_v43, %v265_v50 }
  0xbc   :  { %3924 = vmatprep.mubr.msk.f32.mxu0 %vm553_vm0, %v514_v1  ;;  %v134_v1 = vld [vmem:[%s5930_s0 + $0x360] sm:$0xff] }
  0xbd   :  { %v269_v13 = vmul.f32 %v4859_v2, %v134_v1  ;;  %v528_v17 = vmax.f32 %v400_v62, 0.0  ;;  %v408_v62 = vadd.f32 %v4866_v43, %v273_v46 }
  0xbf   :  { %3925 = vmatmul.mubr.msk.f32.gmra.mxu0 %vm553_vm0, %v515_v8  ;;  %v401_v8 = vadd.f32 %v4866_v43, %v266_v55  ;;  %v404_v29 = vadd.f32 %v4866_v43, %v269_v13 }
  0xc0   :  { %3927 = vmatprep.mubr.msk.f32.mxu0 %vm553_vm0, %v516_v11 }
  0xc1   :  { %v529_v23 = vmax.f32 %v401_v8, 0.0  ;;  %v532_v50 = vmax.f32 %v404_v29, 0.0 }
  0xc3   :  { %3928 = vmatmul.mubr.msk.f32.gmra.mxu0 %vm553_vm0, %v517_v16 }
  0xc4   :  { %3930 = vmatprep.mubr.msk.f32.mxu0 %vm553_vm0, %v518_v19 }
  0xc7   :  { %3931 = vmatmul.mubr.msk.f32.gmra.mxu0 %vm553_vm0, %v519_v24  ;;  %v270_v24 = vmul.f32 %v4859_v2, %v135_v14 }
  0xc8   :  { %3933 = vmatprep.mubr.msk.f32.mxu0 %vm553_vm0, %v520_v27 }
  0xc9   :  { %v405_v40 = vadd.f32 %v4866_v43, %v270_v24  ;;  %v144_v24 = vld [vmem:[%s5930_s0 + $0x3b0] sm:$0xff] }
  0xcb   :  { %v3791_v42 = vpop.f32.mrf.mxu0  ;;  %3934 = vmatmul.mubr.msk.f32.gmra.mxu0 %vm553_vm0, %v521_v32 }
  0xcc   :  { %v1651_v47 = vmul.f32 %v3791_v42, %v4851_v39  ;;  %3936 = vmatprep.mubr.msk.f32.mxu0 %vm553_vm0, %v522_v37 }
  0xcd   :  { %v1004_v51 = vpop.f32.mrf.mxu0 }
  0xce   :  { %v1650_v53 = vmul.f32 %v4851_v39, %v1004_v51  ;;  %v1786_v56 = vadd.f32 %v4877_v48, %v1651_v47  ;;  %v406_v51 = vadd.f32 %v4866_v43, %v271_v34 }
  0xcf   :  { %v3794_v57 = vpop.f32.mrf.mxu0  ;;  %3937 = vmatmul.mubr.msk.f32.gmra.mxu0 %vm553_vm0, %v523_v4 }
  0xd0   :  { %v1653_v60 = vmul.f32 %v3794_v57, %v4851_v39  ;;  %3939 = vmatprep.mubr.msk.f32.mxu0 %vm553_vm0, %v524_v49  ;;  %v1785_v61 = vadd.f32 %v4877_v48, %v1650_v53  ;;  %v1914_v9 = vmax.f32 %v1786_v56, 0.0  ;;  %v533_v57 = vmax.f32 %v405_v40, 0.0  ;;  %v146_v40 = vld [vmem:[%s5930_s0 + $0x3c0] sm:$0xff] }
  0xd1   :  { %v1014_v3 = vpop.f32.mrf.mxu0 }
  0xd2   :  { %v1652_v5 = vmul.f32 %v4851_v39, %v1014_v3  ;;  %v1913_v6 = vmax.f32 %v1785_v61, 0.0  ;;  %v1788_v10 = vadd.f32 %v4877_v48, %v1653_v60 }
  0xd3   :  { %v3797_v11 = vpop.f32.mrf.mxu0  ;;  %3940 = vmatmul.mubr.msk.f32.gmra.mxu0 %vm553_vm0, %v525_v58  ;;  %v407_v58 = vadd.f32 %v4866_v43, %v272_v41 }
  0xd4   :  { %v1787_v15 = vadd.f32 %v4877_v48, %v1652_v5  ;;  %v1655_v16 = vmul.f32 %v3797_v11, %v4851_v39  ;;  %3983 = vmatprep.mubr.msk.f32.mxu1 %vm2042_vm2, %v1913_v6  ;;  %3942 = vmatprep.mubr.msk.f32.mxu0 %vm553_vm0, %v526_v59  ;;  %v1916_v25 = vmax.f32 %v1788_v10, 0.0  ;;  %v534_v5 = vmax.f32 %v406_v51, 0.0 }
  0xd5   :  { %v1024_v19 = vpop.f32.mrf.mxu0  ;;  %3984 = vmatmul.mubr.msk.f32.vlgmr.msra.gmra.mxu1 %vm2042_vm2, %v1914_v9  ;;  %v275_v6 = vmul.f32 %v4859_v2, %v140_v54  ;;  %v535_v11 = vmax.f32 %v407_v58, 0.0  ;;  %v281_v51 = vmul.f32 %v4859_v2, %v146_v40  ;;  %v148_v58 = vld [vmem:[%s5930_s0 + $0x3d0] sm:$0xff] }
  0xd6   :  { %v1915_v21 = vmax.f32 %v1787_v15, 0.0  ;;  %v1654_v22 = vmul.f32 %v4851_v39, %v1024_v19  ;;  %v1790_v26 = vadd.f32 %v4877_v48, %v1655_v16  ;;  %v409_v16 = vadd.f32 %v4866_v43, %v274_v63 }
  0xd7   :  { %v3800_v27 = vpop.f32.mrf.mxu0  ;;  %3943 = vmatmul.mubr.msk.f32.gmra.mxu0 %vm553_vm0, %v527_v7  ;;  %v142_v7 = vld [vmem:[%s5930_s0 + $0x3a0] sm:$0xff] }
  0xd8   :  { %v1789_v31 = vadd.f32 %v4877_v48, %v1654_v22  ;;  %v1657_v32 = vmul.f32 %v3800_v27, %v4851_v39  ;;  %3986 = vmatprep.mubr.msk.f32.mxu1 %vm2042_vm2, %v1915_v21  ;;  %3945 = vmatprep.mubr.msk.f32.mxu0 %vm553_vm0, %v528_v17  ;;  %v1918_v42 = vmax.f32 %v1790_v26, 0.0  ;;  %v277_v17 = vmul.f32 %v4859_v2, %v142_v7 }
  0xd9   :  { %v1034_v36 = vpop.f32.mrf.mxu0  ;;  %3987 = vmatmul.mubr.msk.f32.gmra.mxu1 %vm2042_vm2, %v1916_v25  ;;  %v536_v21 = vmax.f32 %v408_v62, 0.0  ;;  %v410_v22 = vadd.f32 %v4866_v43, %v275_v6  ;;  %v411_v27 = vadd.f32 %v4866_v43, %v276_v12  ;;  %v282_v62 = vmul.f32 %v4859_v2, %v147_v52  ;;  %v149_v6 = vld [vmem:[%s5930_s0 + $0x3d8] sm:$0xff] }
  0xda   :  { %v1917_v37 = vmax.f32 %v1789_v31, 0.0  ;;  %v1656_v38 = vmul.f32 %v4851_v39, %v1034_v36  ;;  %v1792_v4 = vadd.f32 %v4877_v48, %v1657_v32  ;;  %v537_v32 = vmax.f32 %v409_v16, 0.0 }
  0xdb   :  { %v3803_v44 = vpop.f32.mrf.mxu0  ;;  %3946 = vmatmul.mubr.msk.f32.gmra.mxu0 %vm553_vm0, %v529_v23  ;;  %v538_v36 = vmax.f32 %v410_v22, 0.0  ;;  %v284_v16 = vmul.f32 %v4859_v2, %v149_v6 }
  0xdc   :  { %v1791_v47 = vadd.f32 %v4877_v48, %v1656_v38  ;;  %v1659_v49 = vmul.f32 %v3803_v44, %v4851_v39  ;;  %3989 = vmatprep.mubr.msk.f32.mxu1 %vm2042_vm2, %v1917_v37  ;;  %3948 = vmatprep.mubr.msk.f32.mxu0 %vm553_vm0, %v530_v33  ;;  %v1920_v59 = vmax.f32 %v1792_v4, 0.0  ;;  %v412_v33 = vadd.f32 %v4866_v43, %v277_v17  ;;  %v145_v38 = vld [vmem:[%s5930_s0 + $0x3b8] sm:$0xff] }
  0xdd   :  { %v1044_v53 = vpop.f32.mrf.mxu0  ;;  %3990 = vmatmul.mubr.msk.f32.gmra.mxu1 %vm2042_vm2, %v1918_v42  ;;  %v279_v37 = vmul.f32 %v4859_v2, %v144_v24  ;;  %v539_v44 = vmax.f32 %v411_v27, 0.0 }
  0xde   :  { %v1919_v55 = vmax.f32 %v1791_v47, 0.0  ;;  %v1658_v56 = vmul.f32 %v4851_v39, %v1044_v53  ;;  %v1794_v60 = vadd.f32 %v4877_v48, %v1659_v49 }
  0xdf   :  { %v3806_v61 = vpop.f32.mrf.mxu0  ;;  %3949 = vmatmul.mubr.msk.f32.gmra.mxu0 %vm553_vm0, %v531_v45  ;;  %v413_v45 = vadd.f32 %v4866_v43, %v278_v28  ;;  %v152_v28 = vld [vmem:[%s5930_s0 + $0x3f0] sm:$0xff] }
  0xe0   :  { %v1793_v1 = vadd.f32 %v4877_v48, %v1658_v56  ;;  %v1661_v3 = vmul.f32 %v3806_v61, %v4851_v39  ;;  %3992 = vmatprep.mubr.msk.f32.mxu1 %vm2042_vm2, %v1919_v55  ;;  %3951 = vmatprep.mubr.msk.f32.mxu0 %vm553_vm0, %v532_v50  ;;  %v1922_v13 = vmax.f32 %v1794_v60, 0.0  ;;  %v280_v50 = vmul.f32 %v4859_v2, %v145_v38 }
  0xe1   :  { %v1054_v8 = vpop.f32.mrf.mxu0  ;;  %3993 = vmatmul.mubr.msk.f32.gmra.mxu1 %vm2042_vm2, %v1920_v59  ;;  %v540_v55 = vmax.f32 %v412_v33, 0.0  ;;  %v414_v56 = vadd.f32 %v4866_v43, %v279_v37  ;;  %v541_v61 = vmax.f32 %v413_v45, 0.0 }
  0xe2   :  { %v1921_v9 = vmax.f32 %v1793_v1, 0.0  ;;  %v1660_v10 = vmul.f32 %v4851_v39, %v1054_v8  ;;  %v1796_v14 = vadd.f32 %v4877_v48, %v1661_v3  ;;  %v415_v3 = vadd.f32 %v4866_v43, %v280_v50 }
  0xe3   :  { %v3809_v15 = vpop.f32.mrf.mxu0  ;;  %3952 = vmatmul.mubr.msk.f32.gmra.mxu0 %vm553_vm0, %v533_v57 }
  0xe4   :  { %v1795_v19 = vadd.f32 %v4877_v48, %v1660_v10  ;;  %v1663_v20 = vmul.f32 %v3809_v15, %v4851_v39  ;;  %3995 = vmatprep.mubr.msk.f32.mxu1 %vm2042_vm2, %v1921_v9  ;;  %3954 = vmatprep.mubr.msk.f32.mxu0 %vm553_vm0, %v534_v5  ;;  %v1924_v29 = vmax.f32 %v1796_v14, 0.0  ;;  %v416_v5 = vadd.f32 %v4866_v43, %v281_v51 }
  0xe5   :  { %v1064_v23 = vpop.f32.mrf.mxu0  ;;  %3996 = vmatmul.mubr.msk.f32.gmra.mxu1 %vm2042_vm2, %v1922_v13  ;;  %v542_v9 = vmax.f32 %v414_v56, 0.0  ;;  %v283_v10 = vmul.f32 %v4859_v2, %v148_v58  ;;  %v417_v15 = vadd.f32 %v4866_v43, %v282_v62 }
  0xe6   :  { %v1923_v25 = vmax.f32 %v1795_v19, 0.0  ;;  %v1662_v26 = vmul.f32 %v4851_v39, %v1064_v23  ;;  %v1798_v30 = vadd.f32 %v4877_v48, %v1663_v20  ;;  %v543_v20 = vmax.f32 %v415_v3, 0.0 }
  0xe7   :  { %v3812_v31 = vpop.f32.mrf.mxu0  ;;  %3955 = vmatmul.mubr.msk.f32.gmra.mxu0 %vm553_vm0, %v535_v11  ;;  %v150_v11 = vld [vmem:[%s5930_s0 + $0x3e0] sm:$0xff]  ;;  %v544_v24 = vmax.f32 %v416_v5, 0.0 }
  0xe8   :  { %v1797_v34 = vadd.f32 %v4877_v48, %v1662_v26  ;;  %v1665_v35 = vmul.f32 %v3812_v31, %v4851_v39  ;;  %3998 = vmatprep.mubr.msk.f32.mxu1 %vm2042_vm2, %v1923_v25  ;;  %3957 = vmatprep.mubr.msk.f32.mxu0 %vm553_vm0, %v536_v21  ;;  %v1926_v46 = vmax.f32 %v1798_v30, 0.0  ;;  %v285_v21 = vmul.f32 %v4859_v2, %v150_v11  ;;  %v151_v26 = vld [vmem:[%s5930_s0 + $0x3e8] sm:$0xff] }
  0xe9   :  { %v1074_v41 = vpop.f32.mrf.mxu0  ;;  %3999 = vmatmul.mubr.msk.f32.gmra.mxu1 %vm2042_vm2, %v1924_v29  ;;  %v418_v25 = vadd.f32 %v4866_v43, %v283_v10  ;;  %v545_v31 = vmax.f32 %v417_v15, 0.0  ;;  %v286_v37 = vmul.f32 %v4859_v2, %v151_v26 }
  0xea   :  { %v1925_v42 = vmax.f32 %v1797_v34, 0.0  ;;  %v1664_v4 = vmul.f32 %v4851_v39, %v1074_v41  ;;  %v1800_v47 = vadd.f32 %v4877_v48, %v1665_v35 }
  0xeb   :  { %v3815_v49 = vpop.f32.mrf.mxu0  ;;  %3958 = vmatmul.mubr.msk.f32.gmra.mxu0 %vm553_vm0, %v537_v32  ;;  %v419_v32 = vadd.f32 %v4866_v43, %v284_v16  ;;  %v546_v41 = vmax.f32 %v418_v25, 0.0  ;;  %v421_v52 = vadd.f32 %v4866_v43, %v286_v37 }
  0xec   :  { %v1799_v53 = vadd.f32 %v4877_v48, %v1664_v4  ;;  %v1667_v54 = vmul.f32 %v3815_v49, %v4851_v39  ;;  %4001 = vmatprep.mubr.msk.f32.mxu1 %vm2042_vm2, %v1925_v42  ;;  %3960 = vmatprep.mubr.msk.f32.mxu0 %vm553_vm0, %v538_v36  ;;  %v1928_v63 = vmax.f32 %v1800_v47, 0.0  ;;  %v420_v36 = vadd.f32 %v4866_v43, %v285_v21  ;;  %v153_v4 = vld [vmem:[%s5930_s0 + $0x3f8] sm:$0xff] }
  0xed   :  { %v1084_v57 = vpop.f32.mrf.mxu0  ;;  %4002 = vmatmul.mubr.msk.f32.gmra.mxu1 %vm2042_vm2, %v1926_v46  ;;  %v287_v42 = vmul.f32 %v4859_v2, %v152_v28  ;;  %v547_v47 = vmax.f32 %v419_v32, 0.0 }
  0xee   :  { %v1927_v59 = vmax.f32 %v1799_v53, 0.0  ;;  %v1666_v60 = vmul.f32 %v4851_v39, %v1084_v57  ;;  %v1802_v0 = vadd.f32 %v4877_v48, %v1667_v54  ;;  %v288_v53 = vmul.f32 %v4859_v2, %v153_v4 }
  0xef   :  { %v3818_v1 = vpop.f32.mrf.mxu0  ;;  %3961 = vmatmul.mubr.msk.f32.gmra.mxu0 %vm553_vm0, %v539_v44  ;;  %v548_v56 = vmax.f32 %v420_v36, 0.0  ;;  %v422_v57 = vadd.f32 %v4866_v43, %v287_v42 }
  0xf0   :  { %v1801_v7 = vadd.f32 %v4877_v48, %v1666_v60  ;;  %v1669_v8 = vmul.f32 %v3818_v1, %v4851_v39  ;;  %4004 = vmatprep.mubr.msk.f32.mxu1 %vm2042_vm2, %v1927_v59  ;;  %3963 = vmatprep.mubr.msk.f32.mxu0 %vm553_vm0, %v540_v55  ;;  %v1930_v17 = vmax.f32 %v1802_v0, 0.0  ;;  %v423_v0 = vadd.f32 %v4866_v43, %v288_v53 }
  0xf1   :  { %v1094_v12 = vpop.f32.mrf.mxu0  ;;  %4005 = vmatmul.mubr.msk.f32.gmra.mxu1 %vm2042_vm2, %v1928_v63  ;;  %v549_v63 = vmax.f32 %v421_v52, 0.0  ;;  %v550_v5 = vmax.f32 %v422_v57, 0.0 }
  0xf2   :  { %v1929_v13 = vmax.f32 %v1801_v7, 0.0  ;;  %v1668_v14 = vmul.f32 %v4851_v39, %v1094_v12  ;;  %v1804_v18 = vadd.f32 %v4877_v48, %v1669_v8  ;;  %v551_v43 = vmax.f32 %v423_v0, 0.0 }
  0xf3   :  { %v3821_v19 = vpop.f32.mrf.mxu0  ;;  %3964 = vmatmul.mubr.msk.f32.gmra.mxu0 %vm553_vm0, %v541_v61 }
  0xf4   :  { %v1803_v22 = vadd.f32 %v4877_v48, %v1668_v14  ;;  %v1671_v23 = vmul.f32 %v3821_v19, %v4851_v39  ;;  %4007 = vmatprep.mubr.msk.f32.mxu1 %vm2042_vm2, %v1929_v13  ;;  %3966 = vmatprep.mubr.msk.f32.mxu0 %vm553_vm0, %v542_v9  ;;  %v1932_v33 = vmax.f32 %v1804_v18, 0.0 }
  0xf5   :  { %v1104_v27 = vpop.f32.mrf.mxu0  ;;  %4008 = vmatmul.mubr.msk.f32.gmra.mxu1 %vm2042_vm2, %v1930_v17 }
  0xf6   :  { %v1931_v29 = vmax.f32 %v1803_v22, 0.0  ;;  %v1670_v30 = vmul.f32 %v4851_v39, %v1104_v27  ;;  %v1806_v34 = vadd.f32 %v4877_v48, %v1671_v23 }
  0xf7   :  { %v3824_v35 = vpop.f32.mrf.mxu0  ;;  %3967 = vmatmul.mubr.msk.f32.gmra.mxu0 %vm553_vm0, %v543_v20 }
  0xf8   :  { %v1805_v38 = vadd.f32 %v4877_v48, %v1670_v30  ;;  %v1673_v40 = vmul.f32 %v3824_v35, %v4851_v39  ;;  %4010 = vmatprep.mubr.msk.f32.mxu1 %vm2042_vm2, %v1931_v29  ;;  %3969 = vmatprep.mubr.msk.f32.mxu0 %vm553_vm0, %v544_v24  ;;  %v1934_v49 = vmax.f32 %v1806_v34, 0.0 }
  0xf9   :  { %v1114_v44 = vpop.f32.mrf.mxu0  ;;  %4011 = vmatmul.mubr.msk.f32.gmra.mxu1 %vm2042_vm2, %v1932_v33 }
  0xfa   :  { %v1933_v45 = vmax.f32 %v1805_v38, 0.0  ;;  %v1672_v46 = vmul.f32 %v4851_v39, %v1114_v44  ;;  %v1808_v50 = vadd.f32 %v4877_v48, %v1673_v40 }
  0xfb   :  { %v3827_v51 = vpop.f32.mrf.mxu0  ;;  %3970 = vmatmul.mubr.msk.f32.gmra.mxu0 %vm553_vm0, %v545_v31 }
  0xfc   :  { %v1807_v54 = vadd.f32 %v4877_v48, %v1672_v46  ;;  %v1675_v55 = vmul.f32 %v3827_v51, %v4851_v39  ;;  %4013 = vmatprep.mubr.msk.f32.mxu1 %vm2042_vm2, %v1933_v45  ;;  %3972 = vmatprep.mubr.msk.f32.mxu0 %vm553_vm0, %v546_v41  ;;  %v1936_v61 = vmax.f32 %v1808_v50, 0.0 }
  0xfd   :  { %v1124_v58 = vpop.f32.mrf.mxu0  ;;  %4014 = vmatmul.mubr.msk.f32.gmra.mxu1 %vm2042_vm2, %v1934_v49 }
  0xfe   :  { %v1935_v59 = vmax.f32 %v1807_v54, 0.0  ;;  %v1674_v60 = vmul.f32 %v4851_v39, %v1124_v58  ;;  %v1810_v2 = vadd.f32 %v4877_v48, %v1675_v55 }
  0xff   :  { %v3830_v62 = vpop.f32.mrf.mxu0  ;;  %3973 = vmatmul.mubr.msk.f32.gmra.mxu0 %vm553_vm0, %v547_v47 }
 0x100   :  { %v1809_v1 = vadd.f32 %v4877_v48, %v1674_v60  ;;  %v1677_v3 = vmul.f32 %v3830_v62, %v4851_v39  ;;  %4016 = vmatprep.mubr.msk.f32.mxu1 %vm2042_vm2, %v1935_v59  ;;  %3975 = vmatprep.mubr.msk.f32.mxu0 %vm553_vm0, %v548_v56  ;;  %v1938_v9 = vmax.f32 %v1810_v2, 0.0 }
 0x101   :  { %v1134_v6 = vpop.f32.mrf.mxu0  ;;  %4017 = vmatmul.mubr.msk.f32.gmra.mxu1 %vm2042_vm2, %v1936_v61 }
 0x102   :  { %v1937_v7 = vmax.f32 %v1809_v1, 0.0  ;;  %v1676_v8 = vmul.f32 %v4851_v39, %v1134_v6  ;;  %v1812_v10 = vadd.f32 %v4877_v48, %v1677_v3 }
 0x103   :  { %v3833_v11 = vpop.f32.mrf.mxu0  ;;  %3976 = vmatmul.mubr.msk.f32.gmra.mxu0 %vm553_vm0, %v549_v63 }
 0x104   :  { %v1811_v12 = vadd.f32 %v4877_v48, %v1676_v8  ;;  %v1679_v13 = vmul.f32 %v3833_v11, %v4851_v39  ;;  %4019 = vmatprep.mubr.msk.f32.mxu1 %vm2042_vm2, %v1937_v7  ;;  %3978 = vmatprep.mubr.msk.f32.mxu0 %vm553_vm0, %v550_v5  ;;  %v1940_v17 = vmax.f32 %v1812_v10, 0.0 }
 0x105   :  { %v1144_v14 = vpop.f32.mrf.mxu0  ;;  %4020 = vmatmul.mubr.msk.f32.gmra.mxu1 %vm2042_vm2, %v1938_v9 }
 0x106   :  { %v1939_v15 = vmax.f32 %v1811_v12, 0.0  ;;  %v1678_v16 = vmul.f32 %v4851_v39, %v1144_v14  ;;  %v1814_v18 = vadd.f32 %v4877_v48, %v1679_v13 }
 0x107   :  { %v3836_v19 = vpop.f32.mrf.mxu0  ;;  %3979 = vmatmul.mubr.msk.f32.gmra.mxu0 %vm553_vm0, %v551_v43 }
 0x108   :  { %v1813_v20 = vadd.f32 %v4877_v48, %v1678_v16  ;;  %v1681_v21 = vmul.f32 %v3836_v19, %v4851_v39  ;;  %4022 = vmatprep.mubr.msk.f32.mxu1 %vm2042_vm2, %v1939_v15  ;;  %v1942_v25 = vmax.f32 %v1814_v18, 0.0 }
 0x109   :  { %v1154_v22 = vpop.f32.mrf.mxu0  ;;  %4023 = vmatmul.mubr.msk.f32.gmra.mxu1 %vm2042_vm2, %v1940_v17 }
 0x10a   :  { %v1941_v23 = vmax.f32 %v1813_v20, 0.0  ;;  %v1680_v24 = vmul.f32 %v4851_v39, %v1154_v22  ;;  %v1816_v26 = vadd.f32 %v4877_v48, %v1681_v21 }
 0x10b   :  { %v3839_v27 = vpop.f32.mrf.mxu0 }
 0x10c   :  { %v1815_v28 = vadd.f32 %v4877_v48, %v1680_v24  ;;  %v1683_v29 = vmul.f32 %v3839_v27, %v4851_v39  ;;  %4025 = vmatprep.mubr.msk.f32.mxu1 %vm2042_vm2, %v1941_v23  ;;  %v1944_v33 = vmax.f32 %v1816_v26, 0.0 }
 0x10d   :  { %v1164_v30 = vpop.f32.mrf.mxu0  ;;  %4026 = vmatmul.mubr.msk.f32.gmra.mxu1 %vm2042_vm2, %v1942_v25 }
 0x10e   :  { %v1943_v31 = vmax.f32 %v1815_v28, 0.0  ;;  %v1682_v32 = vmul.f32 %v4851_v39, %v1164_v30  ;;  %v1818_v34 = vadd.f32 %v4877_v48, %v1683_v29 }
 0x10f   :  { %v3842_v35 = vpop.f32.mrf.mxu0 }
 0x110   :  { %v1817_v36 = vadd.f32 %v4877_v48, %v1682_v32  ;;  %v1685_v37 = vmul.f32 %v3842_v35, %v4851_v39  ;;  %4028 = vmatprep.mubr.msk.f32.mxu1 %vm2042_vm2, %v1943_v31  ;;  %v1946_v42 = vmax.f32 %v1818_v34, 0.0 }
 0x111   :  { %v1174_v38 = vpop.f32.mrf.mxu0  ;;  %4029 = vmatmul.mubr.msk.f32.gmra.mxu1 %vm2042_vm2, %v1944_v33 }
 0x112   :  { %v1945_v40 = vmax.f32 %v1817_v36, 0.0  ;;  %v1684_v41 = vmul.f32 %v4851_v39, %v1174_v38  ;;  %v1820_v4 = vadd.f32 %v4877_v48, %v1685_v37 }
 0x113   :  { %v3845_v44 = vpop.f32.mrf.mxu0 }
 0x114   :  { %v1819_v45 = vadd.f32 %v4877_v48, %v1684_v41  ;;  %v1687_v46 = vmul.f32 %v3845_v44, %v4851_v39  ;;  %4031 = vmatprep.mubr.msk.f32.mxu1 %vm2042_vm2, %v1945_v40  ;;  %v1948_v51 = vmax.f32 %v1820_v4, 0.0 }
 0x115   :  { %v1184_v47 = vpop.f32.mrf.mxu0  ;;  %4032 = vmatmul.mubr.msk.f32.gmra.mxu1 %vm2042_vm2, %v1946_v42 }
 0x116   :  { %v1947_v49 = vmax.f32 %v1819_v45, 0.0  ;;  %v1686_v50 = vmul.f32 %v4851_v39, %v1184_v47  ;;  %v1822_v52 = vadd.f32 %v4877_v48, %v1687_v46 }
 0x117   :  { %v3848_v53 = vpop.f32.mrf.mxu0 }
 0x118   :  { %v1821_v54 = vadd.f32 %v4877_v48, %v1686_v50  ;;  %v1689_v55 = vmul.f32 %v3848_v53, %v4851_v39  ;;  %4034 = vmatprep.mubr.msk.f32.mxu1 %vm2042_vm2, %v1947_v49  ;;  %v1950_v59 = vmax.f32 %v1822_v52, 0.0 }
 0x119   :  { %v1194_v56 = vpop.f32.mrf.mxu0  ;;  %4035 = vmatmul.mubr.msk.f32.gmra.mxu1 %vm2042_vm2, %v1948_v51 }
 0x11a   :  { %v1949_v57 = vmax.f32 %v1821_v54, 0.0  ;;  %v1688_v58 = vmul.f32 %v4851_v39, %v1194_v56  ;;  %v1824_v60 = vadd.f32 %v4877_v48, %v1689_v55 }
 0x11b   :  { %v3851_v61 = vpop.f32.mrf.mxu0 }
 0x11c   :  { %v1823_v2 = vadd.f32 %v4877_v48, %v1688_v58  ;;  %v1691_v62 = vmul.f32 %v3851_v61, %v4851_v39  ;;  %4037 = vmatprep.mubr.msk.f32.mxu1 %vm2042_vm2, %v1949_v57  ;;  %v1952_v3 = vmax.f32 %v1824_v60, 0.0 }
 0x11d   :  { %v1204_v63 = vpop.f32.mrf.mxu0  ;;  %4038 = vmatmul.mubr.msk.f32.gmra.mxu1 %vm2042_vm2, %v1950_v59 }
 0x11e   :  { %v1951_v0 = vmax.f32 %v1823_v2, 0.0  ;;  %v1690_v1 = vmul.f32 %v4851_v39, %v1204_v63  ;;  %v1826_v5 = vadd.f32 %v4877_v48, %v1691_v62 }
 0x11f   :  { %v3854_v6 = vpop.f32.mrf.mxu0 }
 0x120   :  { %v1825_v7 = vadd.f32 %v4877_v48, %v1690_v1  ;;  %v1693_v8 = vmul.f32 %v3854_v6, %v4851_v39  ;;  %4040 = vmatprep.mubr.msk.f32.mxu1 %vm2042_vm2, %v1951_v0  ;;  %v1954_v43 = vmax.f32 %v1826_v5, 0.0 }
 0x121   :  { %v1214_v9 = vpop.f32.mrf.mxu0  ;;  %4041 = vmatmul.mubr.msk.f32.gmra.mxu1 %vm2042_vm2, %v1952_v3 }
 0x122   :  { %v1953_v10 = vmax.f32 %v1825_v7, 0.0  ;;  %v1692_v11 = vmul.f32 %v4851_v39, %v1214_v9  ;;  %v1828_v12 = vadd.f32 %v4877_v48, %v1693_v8 }
 0x123   :  { %v3857_v13 = vpop.f32.mrf.mxu0 }
 0x124   :  { %v1827_v14 = vadd.f32 %v4877_v48, %v1692_v11  ;;  %v1695_v15 = vmul.f32 %v3857_v13, %v4851_v39  ;;  %4043 = vmatprep.mubr.msk.f32.mxu1 %vm2042_vm2, %v1953_v10  ;;  %v1956_v19 = vmax.f32 %v1828_v12, 0.0 }
 0x125   :  { %v1224_v16 = vpop.f32.mrf.mxu0  ;;  %4044 = vmatmul.mubr.msk.f32.gmra.mxu1 %vm2042_vm2, %v1954_v43 }
 0x126   :  { %v1955_v17 = vmax.f32 %v1827_v14, 0.0  ;;  %v1694_v18 = vmul.f32 %v4851_v39, %v1224_v16  ;;  %v1830_v20 = vadd.f32 %v4877_v48, %v1695_v15 }
 0x127   :  { %v3860_v21 = vpop.f32.mrf.mxu0 }
 0x128   :  { %v1829_v22 = vadd.f32 %v4877_v48, %v1694_v18  ;;  %v1697_v23 = vmul.f32 %v3860_v21, %v4851_v39  ;;  %4046 = vmatprep.mubr.msk.f32.mxu1 %vm2042_vm2, %v1955_v17  ;;  %v1958_v27 = vmax.f32 %v1830_v20, 0.0 }
 0x129   :  { %v1234_v24 = vpop.f32.mrf.mxu0  ;;  %4047 = vmatmul.mubr.msk.f32.gmra.mxu1 %vm2042_vm2, %v1956_v19 }
 0x12a   :  { %v1957_v25 = vmax.f32 %v1829_v22, 0.0  ;;  %v1696_v26 = vmul.f32 %v4851_v39, %v1234_v24  ;;  %v1832_v28 = vadd.f32 %v4877_v48, %v1697_v23 }
 0x12b   :  { %v3863_v29 = vpop.f32.mrf.mxu0 }
 0x12c   :  { %v1831_v30 = vadd.f32 %v4877_v48, %v1696_v26  ;;  %v1699_v31 = vmul.f32 %v3863_v29, %v4851_v39  ;;  %4049 = vmatprep.mubr.msk.f32.mxu1 %vm2042_vm2, %v1957_v25  ;;  %v1960_v35 = vmax.f32 %v1832_v28, 0.0 }
 0x12d   :  { %v1244_v32 = vpop.f32.mrf.mxu0  ;;  %4050 = vmatmul.mubr.msk.f32.gmra.mxu1 %vm2042_vm2, %v1958_v27 }
 0x12e   :  { %v1959_v33 = vmax.f32 %v1831_v30, 0.0  ;;  %v1698_v34 = vmul.f32 %v4851_v39, %v1244_v32  ;;  %v1834_v36 = vadd.f32 %v4877_v48, %v1699_v31 }
 0x12f   :  { %v3866_v37 = vpop.f32.mrf.mxu0 }
 0x130   :  { %v1833_v38 = vadd.f32 %v4877_v48, %v1698_v34  ;;  %v1701_v40 = vmul.f32 %v3866_v37, %v4851_v39  ;;  %4052 = vmatprep.mubr.msk.f32.mxu1 %vm2042_vm2, %v1959_v33  ;;  %v1962_v44 = vmax.f32 %v1834_v36, 0.0 }
 0x131   :  { %v1254_v41 = vpop.f32.mrf.mxu0  ;;  %4053 = vmatmul.mubr.msk.f32.gmra.mxu1 %vm2042_vm2, %v1960_v35 }
 0x132   :  { %v1961_v42 = vmax.f32 %v1833_v38, 0.0  ;;  %v1700_v4 = vmul.f32 %v4851_v39, %v1254_v41  ;;  %v1836_v45 = vadd.f32 %v4877_v48, %v1701_v40 }
 0x133   :  { %v3869_v46 = vpop.f32.mrf.mxu0 }
 0x134   :  { %v1835_v47 = vadd.f32 %v4877_v48, %v1700_v4  ;;  %v1703_v49 = vmul.f32 %v3869_v46, %v4851_v39  ;;  %4055 = vmatprep.mubr.msk.f32.mxu1 %vm2042_vm2, %v1961_v42  ;;  %v1964_v53 = vmax.f32 %v1836_v45, 0.0 }
 0x135   :  { %v1264_v50 = vpop.f32.mrf.mxu0  ;;  %4056 = vmatmul.mubr.msk.f32.gmra.mxu1 %vm2042_vm2, %v1962_v44 }
 0x136   :  { %v1963_v51 = vmax.f32 %v1835_v47, 0.0  ;;  %v1702_v52 = vmul.f32 %v4851_v39, %v1264_v50  ;;  %v1838_v54 = vadd.f32 %v4877_v48, %v1703_v49 }
 0x137   :  { %v3872_v55 = vpop.f32.mrf.mxu0 }
 0x138   :  { %v1837_v56 = vadd.f32 %v4877_v48, %v1702_v52  ;;  %v1705_v57 = vmul.f32 %v3872_v55, %v4851_v39  ;;  %4058 = vmatprep.mubr.msk.f32.mxu1 %vm2042_vm2, %v1963_v51  ;;  %v1966_v61 = vmax.f32 %v1838_v54, 0.0 }
 0x139   :  { %v1274_v58 = vpop.f32.mrf.mxu0  ;;  %4059 = vmatmul.mubr.msk.f32.gmra.mxu1 %vm2042_vm2, %v1964_v53 }
 0x13a   :  { %v1965_v59 = vmax.f32 %v1837_v56, 0.0  ;;  %v1704_v60 = vmul.f32 %v4851_v39, %v1274_v58  ;;  %v1840_v2 = vadd.f32 %v4877_v48, %v1705_v57 }
 0x13b   :  { %v3875_v62 = vpop.f32.mrf.mxu0 }
 0x13c   :  { %v1839_v63 = vadd.f32 %v4877_v48, %v1704_v60  ;;  %v1707_v0 = vmul.f32 %v3875_v62, %v4851_v39  ;;  %4061 = vmatprep.mubr.msk.f32.mxu1 %vm2042_vm2, %v1965_v59  ;;  %v1968_v6 = vmax.f32 %v1840_v2, 0.0 }
 0x13d   :  { %v1284_v1 = vpop.f32.mrf.mxu0  ;;  %4062 = vmatmul.mubr.msk.f32.gmra.mxu1 %vm2042_vm2, %v1966_v61 }
 0x13e   :  { %v1967_v3 = vmax.f32 %v1839_v63, 0.0  ;;  %v1706_v5 = vmul.f32 %v4851_v39, %v1284_v1  ;;  %v1842_v7 = vadd.f32 %v4877_v48, %v1707_v0 }
 0x13f   :  { %v3878_v8 = vpop.f32.mrf.mxu0 }
 0x140   :  { %v1841_v9 = vadd.f32 %v4877_v48, %v1706_v5  ;;  %v1709_v10 = vmul.f32 %v3878_v8, %v4851_v39  ;;  %4064 = vmatprep.mubr.msk.f32.mxu1 %vm2042_vm2, %v1967_v3  ;;  %v1970_v13 = vmax.f32 %v1842_v7, 0.0 }
 0x141   :  { %v1294_v11 = vpop.f32.mrf.mxu0  ;;  %4065 = vmatmul.mubr.msk.f32.gmra.mxu1 %vm2042_vm2, %v1968_v6 }
 0x142   :  { %v1969_v43 = vmax.f32 %v1841_v9, 0.0  ;;  %v1708_v12 = vmul.f32 %v4851_v39, %v1294_v11  ;;  %v1844_v14 = vadd.f32 %v4877_v48, %v1709_v10 }
 0x143   :  { %v3881_v15 = vpop.f32.mrf.mxu0 }
 0x144   :  { %v1843_v16 = vadd.f32 %v4877_v48, %v1708_v12  ;;  %v1711_v17 = vmul.f32 %v3881_v15, %v4851_v39  ;;  %4067 = vmatprep.mubr.msk.f32.mxu1 %vm2042_vm2, %v1969_v43  ;;  %v1972_v21 = vmax.f32 %v1844_v14, 0.0 }
 0x145   :  { %v1304_v18 = vpop.f32.mrf.mxu0  ;;  %4068 = vmatmul.mubr.msk.f32.gmra.mxu1 %vm2042_vm2, %v1970_v13 }
 0x146   :  { %v1971_v19 = vmax.f32 %v1843_v16, 0.0  ;;  %v1710_v20 = vmul.f32 %v4851_v39, %v1304_v18  ;;  %v1846_v22 = vadd.f32 %v4877_v48, %v1711_v17 }
 0x147   :  { %v3884_v23 = vpop.f32.mrf.mxu0 }
 0x148   :  { %v1845_v24 = vadd.f32 %v4877_v48, %v1710_v20  ;;  %v1713_v25 = vmul.f32 %v3884_v23, %v4851_v39  ;;  %4070 = vmatprep.mubr.msk.f32.mxu1 %vm2042_vm2, %v1971_v19  ;;  %v1974_v29 = vmax.f32 %v1846_v22, 0.0  ;;  %v5250_v19 = vld [vmem:[%s5934_s4] ss:$0 sm:$0xff] }
 0x149   :  { %v1314_v26 = vpop.f32.mrf.mxu0  ;;  %4071 = vmatmul.mubr.msk.f32.gmra.mxu1 %vm2042_vm2, %v1972_v21 }
 0x14a   :  { %v1973_v27 = vmax.f32 %v1845_v24, 0.0  ;;  %v1712_v28 = vmul.f32 %v4851_v39, %v1314_v26  ;;  %v1848_v30 = vadd.f32 %v4877_v48, %v1713_v25  ;;  %v5260_v26 = vld [vmem:[%s5935_s5] ss:$0 sm:$0xff] }
 0x14b   :  { %v3887_v31 = vpop.f32.mrf.mxu0 }
 0x14c   :  { %v1847_v32 = vadd.f32 %v4877_v48, %v1712_v28  ;;  %v1715_v33 = vmul.f32 %v3887_v31, %v4851_v39  ;;  %4073 = vmatprep.mubr.msk.f32.mxu1 %vm2042_vm2, %v1973_v27  ;;  %v1976_v37 = vmax.f32 %v1848_v30, 0.0 }
 0x14d   :  { %v1324_v34 = vpop.f32.mrf.mxu0  ;;  %4074 = vmatmul.mubr.msk.f32.gmra.mxu1 %vm2042_vm2, %v1974_v29 }
 0x14e   :  { %v1975_v35 = vmax.f32 %v1847_v32, 0.0  ;;  %v1714_v36 = vmul.f32 %v4851_v39, %v1324_v34  ;;  %v1850_v38 = vadd.f32 %v4877_v48, %v1715_v33 }
 0x14f   :  { %v3890_v40 = vpop.f32.mrf.mxu0 }
 0x150   :  { %v1849_v41 = vadd.f32 %v4877_v48, %v1714_v36  ;;  %v1717_v42 = vmul.f32 %v3890_v40, %v4851_v39  ;;  %4076 = vmatprep.mubr.msk.f32.mxu1 %vm2042_vm2, %v1975_v35  ;;  %v1978_v46 = vmax.f32 %v1850_v38, 0.0 }
 0x151   :  { %v1334_v4 = vpop.f32.mrf.mxu0  ;;  %4077 = vmatmul.mubr.msk.f32.gmra.mxu1 %vm2042_vm2, %v1976_v37 }
 0x152   :  { %v1977_v44 = vmax.f32 %v1849_v41, 0.0  ;;  %v1716_v45 = vmul.f32 %v4851_v39, %v1334_v4  ;;  %v1852_v47 = vadd.f32 %v4877_v48, %v1717_v42 }
 0x153   :  { %v3893_v49 = vpop.f32.mrf.mxu0 }
 0x154   :  { %v1851_v50 = vadd.f32 %v4877_v48, %v1716_v45  ;;  %v1719_v51 = vmul.f32 %v3893_v49, %v4851_v39  ;;  %4079 = vmatprep.mubr.msk.f32.mxu1 %vm2042_vm2, %v1977_v44  ;;  %v1980_v55 = vmax.f32 %v1852_v47, 0.0 }
 0x155   :  { %v1344_v52 = vpop.f32.mrf.mxu0  ;;  %4080 = vmatmul.mubr.msk.f32.gmra.mxu1 %vm2042_vm2, %v1978_v46 }
 0x156   :  { %v1979_v53 = vmax.f32 %v1851_v50, 0.0  ;;  %v1718_v54 = vmul.f32 %v4851_v39, %v1344_v52  ;;  %v1854_v56 = vadd.f32 %v4877_v48, %v1719_v51 }
 0x157   :  { %v3896_v57 = vpop.f32.mrf.mxu0 }
 0x158   :  { %v1853_v58 = vadd.f32 %v4877_v48, %v1718_v54  ;;  %v1721_v59 = vmul.f32 %v3896_v57, %v4851_v39  ;;  %4082 = vmatprep.mubr.msk.f32.mxu1 %vm2042_vm2, %v1979_v53  ;;  %v1982_v62 = vmax.f32 %v1854_v56, 0.0 }
 0x159   :  { %v1354_v60 = vpop.f32.mrf.mxu0  ;;  %4083 = vmatmul.mubr.msk.f32.gmra.mxu1 %vm2042_vm2, %v1980_v55 }
 0x15a   :  { %v1981_v61 = vmax.f32 %v1853_v58, 0.0  ;;  %v1720_v2 = vmul.f32 %v4851_v39, %v1354_v60  ;;  %v1856_v63 = vadd.f32 %v4877_v48, %v1721_v59 }
 0x15b   :  { %v3899_v0 = vpop.f32.mrf.mxu0 }
 0x15c   :  { %v1855_v1 = vadd.f32 %v4877_v48, %v1720_v2  ;;  %v1723_v3 = vmul.f32 %v3899_v0, %v4851_v39  ;;  %4085 = vmatprep.mubr.msk.f32.mxu1 %vm2042_vm2, %v1981_v61  ;;  %v1984_v8 = vmax.f32 %v1856_v63, 0.0 }
 0x15d   :  { %v1364_v5 = vpop.f32.mrf.mxu0  ;;  %4086 = vmatmul.mubr.msk.f32.gmra.mxu1 %vm2042_vm2, %v1982_v62 }
 0x15e   :  { %v1983_v6 = vmax.f32 %v1855_v1, 0.0  ;;  %v1722_v7 = vmul.f32 %v4851_v39, %v1364_v5  ;;  %v1858_v9 = vadd.f32 %v4877_v48, %v1723_v3 }
 0x15f   :  { %v3902_v10 = vpop.f32.mrf.mxu0 }
 0x160   :  { %v1857_v11 = vadd.f32 %v4877_v48, %v1722_v7  ;;  %v1725_v43 = vmul.f32 %v3902_v10, %v4851_v39  ;;  %4088 = vmatprep.mubr.msk.f32.mxu1 %vm2042_vm2, %v1983_v6  ;;  %v1986_v15 = vmax.f32 %v1858_v9, 0.0 }
 0x161   :  { %v1374_v12 = vpop.f32.mrf.mxu0  ;;  %4089 = vmatmul.mubr.msk.f32.gmra.mxu1 %vm2042_vm2, %v1984_v8 }
 0x162   :  { %v1985_v13 = vmax.f32 %v1857_v11, 0.0  ;;  %v1724_v14 = vmul.f32 %v4851_v39, %v1374_v12  ;;  %v1860_v16 = vadd.f32 %v4877_v48, %v1725_v43 }
 0x163   :  { %v3905_v17 = vpop.f32.mrf.mxu0 }
 0x164   :  { %v1859_v18 = vadd.f32 %v4877_v48, %v1724_v14  ;;  %v1727_v20 = vmul.f32 %v5250_v19, %v3905_v17  ;;  %4091 = vmatprep.mubr.msk.f32.mxu1 %vm2042_vm2, %v1985_v13  ;;  %v1988_v23 = vmax.f32 %v1860_v16, 0.0 }
 0x165   :  { %v1384_v21 = vpop.f32.mrf.mxu0  ;;  %4092 = vmatmul.mubr.msk.f32.gmra.mxu1 %vm2042_vm2, %v1986_v15 }
 0x166   :  { %v1987_v22 = vmax.f32 %v1859_v18, 0.0  ;;  %v1726_v39 = vmul.f32 %v5250_v19, %v1384_v21  ;;  %v1862_v24 = vadd.f32 %v4877_v48, %v1727_v20 }
 0x167   :  { %v3908_v25 = vpop.f32.mrf.mxu0 }
 0x168   :  { %v1861_v27 = vadd.f32 %v5260_v26, %v1726_v39  ;;  %v1729_v28 = vmul.f32 %v5250_v19, %v3908_v25  ;;  %4094 = vmatprep.mubr.msk.f32.mxu1 %vm2042_vm2, %v1987_v22  ;;  %v1990_v32 = vmax.f32 %v1862_v24, 0.0 }
 0x169   :  { %v1394_v29 = vpop.f32.mrf.mxu0  ;;  %4095 = vmatmul.mubr.msk.f32.gmra.mxu1 %vm2042_vm2, %v1988_v23 }
 0x16a   :  { %v1989_v30 = vmax.f32 %v1861_v27, 0.0  ;;  %v1728_v31 = vmul.f32 %v5250_v19, %v1394_v29  ;;  %v1864_v48 = vadd.f32 %v5260_v26, %v1729_v28 }
 0x16b   :  { %v3911_v33 = vpop.f32.mrf.mxu0 }
 0x16c   :  { %v1863_v34 = vadd.f32 %v5260_v26, %v1728_v31  ;;  %v1731_v35 = vmul.f32 %v5250_v19, %v3911_v33  ;;  %4097 = vmatprep.mubr.msk.f32.mxu1 %vm2042_vm2, %v1989_v30  ;;  %v1992_v40 = vmax.f32 %v1864_v48, 0.0 }
 0x16d   :  { %v1404_v36 = vpop.f32.mrf.mxu0  ;;  %4098 = vmatmul.mubr.msk.f32.gmra.mxu1 %vm2042_vm2, %v1990_v32 }
 0x16e   :  { %v1991_v37 = vmax.f32 %v1863_v34, 0.0  ;;  %v1730_v38 = vmul.f32 %v5250_v19, %v1404_v36  ;;  %v1866_v41 = vadd.f32 %v5260_v26, %v1731_v35 }
 0x16f   :  { %v3914_v42 = vpop.f32.mrf.mxu0 }
 0x170   :  { %v1865_v4 = vadd.f32 %v5260_v26, %v1730_v38  ;;  %v1733_v44 = vmul.f32 %v5250_v19, %v3914_v42  ;;  %4100 = vmatprep.mubr.msk.f32.mxu1 %vm2042_vm2, %v1991_v37  ;;  %v1994_v49 = vmax.f32 %v1866_v41, 0.0 }
 0x171   :  { %v1414_v45 = vpop.f32.mrf.mxu0  ;;  %4101 = vmatmul.mubr.msk.f32.gmra.mxu1 %vm2042_vm2, %v1992_v40 }
 0x172   :  { %v1993_v46 = vmax.f32 %v1865_v4, 0.0  ;;  %v1732_v47 = vmul.f32 %v5250_v19, %v1414_v45  ;;  %v1868_v50 = vadd.f32 %v5260_v26, %v1733_v44 }
 0x173   :  { %v3917_v51 = vpop.f32.mrf.mxu0 }
 0x174   :  { %v1867_v52 = vadd.f32 %v5260_v26, %v1732_v47  ;;  %v1735_v53 = vmul.f32 %v5250_v19, %v3917_v51  ;;  %4103 = vmatprep.mubr.msk.f32.mxu1 %vm2042_vm2, %v1993_v46  ;;  %v1996_v57 = vmax.f32 %v1868_v50, 0.0 }
 0x175   :  { %v1424_v54 = vpop.f32.mrf.mxu0  ;;  %4104 = vmatmul.mubr.msk.f32.gmra.mxu1 %vm2042_vm2, %v1994_v49 }
 0x176   :  { %v1995_v55 = vmax.f32 %v1867_v52, 0.0  ;;  %v1734_v56 = vmul.f32 %v5250_v19, %v1424_v54  ;;  %v1870_v58 = vadd.f32 %v5260_v26, %v1735_v53 }
 0x177   :  { %v3920_v59 = vpop.f32.mrf.mxu0 }
 0x178   :  { %v1869_v60 = vadd.f32 %v5260_v26, %v1734_v56  ;;  %v1737_v61 = vmul.f32 %v5250_v19, %v3920_v59  ;;  %4106 = vmatprep.mubr.msk.f32.mxu1 %vm2042_vm2, %v1995_v55  ;;  %v1998_v0 = vmax.f32 %v1870_v58, 0.0 }
 0x179   :  { %v1434_v2 = vpop.f32.mrf.mxu0  ;;  %4107 = vmatmul.mubr.msk.f32.gmra.mxu1 %vm2042_vm2, %v1996_v57 }
 0x17a   :  { %v1997_v62 = vmax.f32 %v1869_v60, 0.0  ;;  %v1736_v63 = vmul.f32 %v5250_v19, %v1434_v2  ;;  %v1872_v1 = vadd.f32 %v5260_v26, %v1737_v61 }
 0x17b   :  { %v3923_v3 = vpop.f32.mrf.mxu0 }
 0x17c   :  { %v1871_v5 = vadd.f32 %v5260_v26, %v1736_v63  ;;  %v1739_v6 = vmul.f32 %v5250_v19, %v3923_v3  ;;  %4109 = vmatprep.mubr.msk.f32.mxu1 %vm2042_vm2, %v1997_v62  ;;  %v2000_v10 = vmax.f32 %v1872_v1, 0.0 }
 0x17d   :  { %v1444_v7 = vpop.f32.mrf.mxu0  ;;  %4110 = vmatmul.mubr.msk.f32.gmra.mxu1 %vm2042_vm2, %v1998_v0 }
 0x17e   :  { %v1999_v8 = vmax.f32 %v1871_v5, 0.0  ;;  %v1738_v9 = vmul.f32 %v5250_v19, %v1444_v7  ;;  %v1874_v11 = vadd.f32 %v5260_v26, %v1739_v6 }
 0x17f   :  { %v3926_v43 = vpop.f32.mrf.mxu0 }
 0x180   :  { %v1873_v12 = vadd.f32 %v5260_v26, %v1738_v9  ;;  %v1741_v13 = vmul.f32 %v5250_v19, %v3926_v43  ;;  %4112 = vmatprep.mubr.msk.f32.mxu1 %vm2042_vm2, %v1999_v8  ;;  %v2002_v17 = vmax.f32 %v1874_v11, 0.0 }
 0x181   :  { %v1454_v14 = vpop.f32.mrf.mxu0  ;;  %4113 = vmatmul.mubr.msk.f32.gmra.mxu1 %vm2042_vm2, %v2000_v10 }
 0x182   :  { %v2001_v15 = vmax.f32 %v1873_v12, 0.0  ;;  %v1740_v16 = vmul.f32 %v5250_v19, %v1454_v14  ;;  %v1876_v18 = vadd.f32 %v5260_v26, %v1741_v13 }
 0x183   :  { %v3929_v20 = vpop.f32.mrf.mxu0 }
 0x184   :  { %v1875_v21 = vadd.f32 %v5260_v26, %v1740_v16  ;;  %v1743_v22 = vmul.f32 %v5250_v19, %v3929_v20  ;;  %4115 = vmatprep.mubr.msk.f32.mxu1 %vm2042_vm2, %v2001_v15  ;;  %v2004_v25 = vmax.f32 %v1876_v18, 0.0 }
 0x185   :  { %v1464_v39 = vpop.f32.mrf.mxu0  ;;  %4116 = vmatmul.mubr.msk.f32.gmra.mxu1 %vm2042_vm2, %v2002_v17 }
 0x186   :  { %v2003_v23 = vmax.f32 %v1875_v21, 0.0  ;;  %v1742_v24 = vmul.f32 %v5250_v19, %v1464_v39  ;;  %v1878_v27 = vadd.f32 %v5260_v26, %v1743_v22 }
 0x187   :  { %v3932_v28 = vpop.f32.mrf.mxu0 }
 0x188   :  { %v1877_v29 = vadd.f32 %v5260_v26, %v1742_v24  ;;  %v1745_v30 = vmul.f32 %v5250_v19, %v3932_v28  ;;  %4118 = vmatprep.mubr.msk.f32.mxu1 %vm2042_vm2, %v2003_v23  ;;  %v2006_v33 = vmax.f32 %v1878_v27, 0.0 }
 0x189   :  { %v1474_v31 = vpop.f32.mrf.mxu0  ;;  %4119 = vmatmul.mubr.msk.f32.gmra.mxu1 %vm2042_vm2, %v2004_v25 }
 0x18a   :  { %v2005_v32 = vmax.f32 %v1877_v29, 0.0  ;;  %v1744_v48 = vmul.f32 %v5250_v19, %v1474_v31  ;;  %v1880_v34 = vadd.f32 %v5260_v26, %v1745_v30 }
 0x18b   :  { %v3935_v35 = vpop.f32.mrf.mxu0 }
 0x18c   :  { %v1879_v36 = vadd.f32 %v5260_v26, %v1744_v48  ;;  %v1747_v37 = vmul.f32 %v5250_v19, %v3935_v35  ;;  %4121 = vmatprep.mubr.msk.f32.mxu1 %vm2042_vm2, %v2005_v32  ;;  %v2008_v42 = vmax.f32 %v1880_v34, 0.0 }
 0x18d   :  { %v1484_v38 = vpop.f32.mrf.mxu0  ;;  %4122 = vmatmul.mubr.msk.f32.gmra.mxu1 %vm2042_vm2, %v2006_v33 }
 0x18e   :  { %v2007_v40 = vmax.f32 %v1879_v36, 0.0  ;;  %v1746_v41 = vmul.f32 %v5250_v19, %v1484_v38  ;;  %v1882_v4 = vadd.f32 %v5260_v26, %v1747_v37 }
 0x18f   :  { %v3938_v44 = vpop.f32.mrf.mxu0 }
 0x190   :  { %v1881_v45 = vadd.f32 %v5260_v26, %v1746_v41  ;;  %v1749_v46 = vmul.f32 %v5250_v19, %v3938_v44  ;;  %4124 = vmatprep.mubr.msk.f32.mxu1 %vm2042_vm2, %v2007_v40  ;;  %v2010_v51 = vmax.f32 %v1882_v4, 0.0 }
 0x191   :  { %v1494_v47 = vpop.f32.mrf.mxu0  ;;  %4125 = vmatmul.mubr.msk.f32.gmra.mxu1 %vm2042_vm2, %v2008_v42 }
 0x192   :  { %v2009_v49 = vmax.f32 %v1881_v45, 0.0  ;;  %v1748_v50 = vmul.f32 %v5250_v19, %v1494_v47  ;;  %v1884_v52 = vadd.f32 %v5260_v26, %v1749_v46 }
 0x193   :  { %v3941_v53 = vpop.f32.mrf.mxu0 }
 0x194   :  { %v1883_v54 = vadd.f32 %v5260_v26, %v1748_v50  ;;  %v1751_v55 = vmul.f32 %v5250_v19, %v3941_v53  ;;  %4127 = vmatprep.mubr.msk.f32.mxu1 %vm2042_vm2, %v2009_v49  ;;  %v2012_v60 = vmax.f32 %v1884_v52, 0.0 }
 0x195   :  { %v1504_v56 = vpop.f32.mrf.mxu0  ;;  %v3985_v57 = vpop.f32.mrf.mxu1  ;;  %4128 = vmatmul.mubr.msk.f32.gmra.mxu1 %vm2042_vm2, %v2010_v51 }
 0x196   :  { %v2011_v58 = vmax.f32 %v1883_v54, 0.0  ;;  %v1750_v59 = vmul.f32 %v5250_v19, %v1504_v56  ;;  %3137 = vst.msk [vmem:[%s5936_s7 + $0x8] sm:$0xff] %vm553_vm0, %v3985_v57  ;;  %v1886_v61 = vadd.f32 %v5260_v26, %v1751_v55 }
 0x197   :  { %v3944_v2 = vpop.f32.mrf.mxu0  ;;  %v2497_v62 = vpop.f32.mrf.mxu1 }
 0x198   :  { %v1885_v63 = vadd.f32 %v5260_v26, %v1750_v59  ;;  %v1753_v0 = vmul.f32 %v5250_v19, %v3944_v2  ;;  %3136 = vst.msk [vmem:[%s5936_s7] sm:$0xff] %vm553_vm0, %v2497_v62  ;;  %4130 = vmatprep.mubr.msk.f32.mxu1 %vm2042_vm2, %v2011_v58  ;;  %v2014_v7 = vmax.f32 %v1886_v61, 0.0 }
 0x199   :  { %v1514_v1 = vpop.f32.mrf.mxu0  ;;  %v3988_v3 = vpop.f32.mrf.mxu1  ;;  %4131 = vmatmul.mubr.msk.f32.gmra.mxu1 %vm2042_vm2, %v2012_v60 }
 0x19a   :  { %v2013_v5 = vmax.f32 %v1885_v63, 0.0  ;;  %v1752_v6 = vmul.f32 %v5250_v19, %v1514_v1  ;;  %3139 = vst.msk [vmem:[%s5936_s7 + $0x18] sm:$0xff] %vm553_vm0, %v3988_v3  ;;  %v1888_v8 = vadd.f32 %v5260_v26, %v1753_v0 }
 0x19b   :  { %v3947_v9 = vpop.f32.mrf.mxu0  ;;  %v2507_v10 = vpop.f32.mrf.mxu1 }
 0x19c   :  { %v1887_v11 = vadd.f32 %v5260_v26, %v1752_v6  ;;  %v1755_v43 = vmul.f32 %v5250_v19, %v3947_v9  ;;  %3138 = vst.msk [vmem:[%s5936_s7 + $0x10] sm:$0xff] %vm553_vm0, %v2507_v10  ;;  %4133 = vmatprep.mubr.msk.f32.mxu1 %vm2042_vm2, %v2013_v5  ;;  %v2016_v16 = vmax.f32 %v1888_v8, 0.0 }
 0x19d   :  { %v1524_v12 = vpop.f32.mrf.mxu0  ;;  %v3991_v13 = vpop.f32.mrf.mxu1  ;;  %4134 = vmatmul.mubr.msk.f32.gmra.mxu1 %vm2042_vm2, %v2014_v7 }
 0x19e   :  { %v2015_v14 = vmax.f32 %v1887_v11, 0.0  ;;  %v1754_v15 = vmul.f32 %v5250_v19, %v1524_v12  ;;  %3141 = vst.msk [vmem:[%s5936_s7 + $0x28] sm:$0xff] %vm553_vm0, %v3991_v13  ;;  %v1890_v17 = vadd.f32 %v5260_v26, %v1755_v43 }
 0x19f   :  { %v3950_v18 = vpop.f32.mrf.mxu0  ;;  %v2517_v20 = vpop.f32.mrf.mxu1 }
 0x1a0   :  { %v1889_v21 = vadd.f32 %v5260_v26, %v1754_v15  ;;  %v1757_v22 = vmul.f32 %v5250_v19, %v3950_v18  ;;  %3140 = vst.msk [vmem:[%s5936_s7 + $0x20] sm:$0xff] %vm553_vm0, %v2517_v20  ;;  %4136 = vmatprep.mubr.msk.f32.mxu1 %vm2042_vm2, %v2015_v14  ;;  %v2018_v27 = vmax.f32 %v1890_v17, 0.0 }
 0x1a1   :  { %v1534_v39 = vpop.f32.mrf.mxu0  ;;  %v3994_v23 = vpop.f32.mrf.mxu1  ;;  %4137 = vmatmul.mubr.msk.f32.gmra.mxu1 %vm2042_vm2, %v2016_v16 }
 0x1a2   :  { %v2017_v24 = vmax.f32 %v1889_v21, 0.0  ;;  %v1756_v25 = vmul.f32 %v5250_v19, %v1534_v39  ;;  %3143 = vst.msk [vmem:[%s5936_s7 + $0x38] sm:$0xff] %vm553_vm0, %v3994_v23  ;;  %v1892_v28 = vadd.f32 %v5260_v26, %v1757_v22 }
 0x1a3   :  { %v3953_v29 = vpop.f32.mrf.mxu0  ;;  %v2527_v30 = vpop.f32.mrf.mxu1 }
 0x1a4   :  { %v1891_v31 = vadd.f32 %v5260_v26, %v1756_v25  ;;  %v1759_v32 = vmul.f32 %v5250_v19, %v3953_v29  ;;  %3142 = vst.msk [vmem:[%s5936_s7 + $0x30] sm:$0xff] %vm553_vm0, %v2527_v30  ;;  %4139 = vmatprep.mubr.msk.f32.mxu1 %vm2042_vm2, %v2017_v24  ;;  %v2020_v36 = vmax.f32 %v1892_v28, 0.0 }
 0x1a5   :  { %v1544_v48 = vpop.f32.mrf.mxu0  ;;  %v3997_v33 = vpop.f32.mrf.mxu1  ;;  %4140 = vmatmul.mubr.msk.f32.gmra.mxu1 %vm2042_vm2, %v2018_v27 }
 0x1a6   :  { %v2019_v34 = vmax.f32 %v1891_v31, 0.0  ;;  %v1758_v35 = vmul.f32 %v5250_v19, %v1544_v48  ;;  %3145 = vst.msk [vmem:[%s5936_s7 + $0x48] sm:$0xff] %vm553_vm0, %v3997_v33  ;;  %v1894_v37 = vadd.f32 %v5260_v26, %v1759_v32 }
 0x1a7   :  { %v3956_v38 = vpop.f32.mrf.mxu0  ;;  %v2537_v40 = vpop.f32.mrf.mxu1 }
 0x1a8   :  { %v1893_v41 = vadd.f32 %v5260_v26, %v1758_v35  ;;  %v1761_v42 = vmul.f32 %v5250_v19, %v3956_v38  ;;  %3144 = vst.msk [vmem:[%s5936_s7 + $0x40] sm:$0xff] %vm553_vm0, %v2537_v40  ;;  %4142 = vmatprep.mubr.msk.f32.mxu1 %vm2042_vm2, %v2019_v34  ;;  %v2022_v47 = vmax.f32 %v1894_v37, 0.0 }
 0x1a9   :  { %v1554_v4 = vpop.f32.mrf.mxu0  ;;  %v4000_v44 = vpop.f32.mrf.mxu1  ;;  %4143 = vmatmul.mubr.msk.f32.gmra.mxu1 %vm2042_vm2, %v2020_v36 }
 0x1aa   :  { %v2021_v45 = vmax.f32 %v1893_v41, 0.0  ;;  %v1760_v46 = vmul.f32 %v5250_v19, %v1554_v4  ;;  %3147 = vst.msk [vmem:[%s5936_s7 + $0x58] sm:$0xff] %vm553_vm0, %v4000_v44  ;;  %v1896_v49 = vadd.f32 %v5260_v26, %v1761_v42 }
 0x1ab   :  { %v3959_v50 = vpop.f32.mrf.mxu0  ;;  %v2547_v51 = vpop.f32.mrf.mxu1 }
 0x1ac   :  { %v1895_v52 = vadd.f32 %v5260_v26, %v1760_v46  ;;  %v1763_v53 = vmul.f32 %v5250_v19, %v3959_v50  ;;  %3146 = vst.msk [vmem:[%s5936_s7 + $0x50] sm:$0xff] %vm553_vm0, %v2547_v51  ;;  %4145 = vmatprep.mubr.msk.f32.mxu1 %vm2042_vm2, %v2021_v45  ;;  %v2024_v58 = vmax.f32 %v1896_v49, 0.0 }
 0x1ad   :  { %v1564_v54 = vpop.f32.mrf.mxu0  ;;  %v4003_v55 = vpop.f32.mrf.mxu1  ;;  %4146 = vmatmul.mubr.msk.f32.gmra.mxu1 %vm2042_vm2, %v2022_v47 }
 0x1ae   :  { %v2023_v56 = vmax.f32 %v1895_v52, 0.0  ;;  %v1762_v57 = vmul.f32 %v5250_v19, %v1564_v54  ;;  %3149 = vst.msk [vmem:[%s5936_s7 + $0x68] sm:$0xff] %vm553_vm0, %v4003_v55  ;;  %v1898_v59 = vadd.f32 %v5260_v26, %v1763_v53 }
 0x1af   :  { %v3962_v60 = vpop.f32.mrf.mxu0  ;;  %v2557_v61 = vpop.f32.mrf.mxu1 }
 0x1b0   :  { %v1897_v2 = vadd.f32 %v5260_v26, %v1762_v57  ;;  %v1765_v62 = vmul.f32 %v5250_v19, %v3962_v60  ;;  %3148 = vst.msk [vmem:[%s5936_s7 + $0x60] sm:$0xff] %vm553_vm0, %v2557_v61  ;;  %4148 = vmatprep.mubr.msk.f32.mxu1 %vm2042_vm2, %v2023_v56  ;;  %v2026_v5 = vmax.f32 %v1898_v59, 0.0 }
 0x1b1   :  { %v1574_v63 = vpop.f32.mrf.mxu0  ;;  %v4006_v0 = vpop.f32.mrf.mxu1  ;;  %4149 = vmatmul.mubr.msk.f32.gmra.mxu1 %vm2042_vm2, %v2024_v58 }
 0x1b2   :  { %v2025_v1 = vmax.f32 %v1897_v2, 0.0  ;;  %v1764_v3 = vmul.f32 %v5250_v19, %v1574_v63  ;;  %3151 = vst.msk [vmem:[%s5936_s7 + $0x78] sm:$0xff] %vm553_vm0, %v4006_v0  ;;  %v1900_v6 = vadd.f32 %v5260_v26, %v1765_v62 }
 0x1b3   :  { %v3965_v7 = vpop.f32.mrf.mxu0  ;;  %v2567_v8 = vpop.f32.mrf.mxu1 }
 0x1b4   :  { %v1899_v9 = vadd.f32 %v5260_v26, %v1764_v3  ;;  %v1767_v10 = vmul.f32 %v5250_v19, %v3965_v7  ;;  %3150 = vst.msk [vmem:[%s5936_s7 + $0x70] sm:$0xff] %vm553_vm0, %v2567_v8  ;;  %4151 = vmatprep.mubr.msk.f32.mxu1 %vm2042_vm2, %v2025_v1  ;;  %v2028_v14 = vmax.f32 %v1900_v6, 0.0 }
 0x1b5   :  { %v1584_v11 = vpop.f32.mrf.mxu0  ;;  %v4009_v43 = vpop.f32.mrf.mxu1  ;;  %4152 = vmatmul.mubr.msk.f32.gmra.mxu1 %vm2042_vm2, %v2026_v5 }
 0x1b6   :  { %v2027_v12 = vmax.f32 %v1899_v9, 0.0  ;;  %v1766_v13 = vmul.f32 %v5250_v19, %v1584_v11  ;;  %3153 = vst.msk [vmem:[%s5936_s7 + $0x88] sm:$0xff] %vm553_vm0, %v4009_v43  ;;  %v1902_v15 = vadd.f32 %v5260_v26, %v1767_v10 }
 0x1b7   :  { %v3968_v16 = vpop.f32.mrf.mxu0  ;;  %v2577_v17 = vpop.f32.mrf.mxu1 }
 0x1b8   :  { %v1901_v18 = vadd.f32 %v5260_v26, %v1766_v13  ;;  %v1769_v20 = vmul.f32 %v5250_v19, %v3968_v16  ;;  %3152 = vst.msk [vmem:[%s5936_s7 + $0x80] sm:$0xff] %vm553_vm0, %v2577_v17  ;;  %4154 = vmatprep.mubr.msk.f32.mxu1 %vm2042_vm2, %v2027_v12  ;;  %v2030_v24 = vmax.f32 %v1902_v15, 0.0 }
 0x1b9   :  { %v1594_v21 = vpop.f32.mrf.mxu0  ;;  %v4012_v22 = vpop.f32.mrf.mxu1  ;;  %4155 = vmatmul.mubr.msk.f32.gmra.mxu1 %vm2042_vm2, %v2028_v14 }
 0x1ba   :  { %v2029_v39 = vmax.f32 %v1901_v18, 0.0  ;;  %v1768_v23 = vmul.f32 %v5250_v19, %v1594_v21  ;;  %3155 = vst.msk [vmem:[%s5936_s7 + $0x98] sm:$0xff] %vm553_vm0, %v4012_v22  ;;  %v1904_v25 = vadd.f32 %v5260_v26, %v1769_v20 }
 0x1bb   :  { %v3971_v27 = vpop.f32.mrf.mxu0  ;;  %v2587_v28 = vpop.f32.mrf.mxu1 }
 0x1bc   :  { %v1903_v29 = vadd.f32 %v5260_v26, %v1768_v23  ;;  %v1771_v30 = vmul.f32 %v5250_v19, %v3971_v27  ;;  %3154 = vst.msk [vmem:[%s5936_s7 + $0x90] sm:$0xff] %vm553_vm0, %v2587_v28  ;;  %4157 = vmatprep.mubr.msk.f32.mxu1 %vm2042_vm2, %v2029_v39  ;;  %v2032_v34 = vmax.f32 %v1904_v25, 0.0 }
 0x1bd   :  { %v1604_v31 = vpop.f32.mrf.mxu0  ;;  %v4015_v32 = vpop.f32.mrf.mxu1  ;;  %4158 = vmatmul.mubr.msk.f32.gmra.mxu1 %vm2042_vm2, %v2030_v24 }
 0x1be   :  { %v2031_v48 = vmax.f32 %v1903_v29, 0.0  ;;  %v1770_v33 = vmul.f32 %v5250_v19, %v1604_v31  ;;  %3157 = vst.msk [vmem:[%s5936_s7 + $0xa8] sm:$0xff] %vm553_vm0, %v4015_v32  ;;  %v1906_v35 = vadd.f32 %v5260_v26, %v1771_v30 }
 0x1bf   :  { %v3974_v36 = vpop.f32.mrf.mxu0  ;;  %v2597_v37 = vpop.f32.mrf.mxu1 }
 0x1c0   :  { %v1905_v38 = vadd.f32 %v5260_v26, %v1770_v33  ;;  %v1773_v40 = vmul.f32 %v5250_v19, %v3974_v36  ;;  %3156 = vst.msk [vmem:[%s5936_s7 + $0xa0] sm:$0xff] %vm553_vm0, %v2597_v37  ;;  %4160 = vmatprep.mubr.msk.f32.mxu1 %vm2042_vm2, %v2031_v48  ;;  %v2034_v45 = vmax.f32 %v1906_v35, 0.0 }
 0x1c1   :  { %v1614_v41 = vpop.f32.mrf.mxu0  ;;  %v4018_v42 = vpop.f32.mrf.mxu1  ;;  %4161 = vmatmul.mubr.msk.f32.gmra.mxu1 %vm2042_vm2, %v2032_v34 }
 0x1c2   :  { %v2033_v4 = vmax.f32 %v1905_v38, 0.0  ;;  %v1772_v44 = vmul.f32 %v5250_v19, %v1614_v41  ;;  %3159 = vst.msk [vmem:[%s5936_s7 + $0xb8] sm:$0xff] %vm553_vm0, %v4018_v42  ;;  %v1908_v46 = vadd.f32 %v5260_v26, %v1773_v40 }
 0x1c3   :  { %v3977_v47 = vpop.f32.mrf.mxu0  ;;  %v2607_v49 = vpop.f32.mrf.mxu1 }
 0x1c4   :  { %v1907_v50 = vadd.f32 %v5260_v26, %v1772_v44  ;;  %v1775_v51 = vmul.f32 %v5250_v19, %v3977_v47  ;;  %3158 = vst.msk [vmem:[%s5936_s7 + $0xb0] sm:$0xff] %vm553_vm0, %v2607_v49  ;;  %4163 = vmatprep.mubr.msk.f32.mxu1 %vm2042_vm2, %v2033_v4  ;;  %v2036_v56 = vmax.f32 %v1908_v46, 0.0 }
 0x1c5   :  { %v1624_v52 = vpop.f32.mrf.mxu0  ;;  %v4021_v53 = vpop.f32.mrf.mxu1  ;;  %4164 = vmatmul.mubr.msk.f32.gmra.mxu1 %vm2042_vm2, %v2034_v45 }
 0x1c6   :  { %v2035_v54 = vmax.f32 %v1907_v50, 0.0  ;;  %v1774_v55 = vmul.f32 %v5250_v19, %v1624_v52  ;;  %3161 = vst.msk [vmem:[%s5936_s7 + $0xc8] sm:$0xff] %vm553_vm0, %v4021_v53  ;;  %v1910_v57 = vadd.f32 %v5260_v26, %v1775_v51 }
 0x1c7   :  { %v3980_v58 = vpop.f32.mrf.mxu0  ;;  %v2617_v59 = vpop.f32.mrf.mxu1 }
 0x1c8   :  { %v1909_v60 = vadd.f32 %v5260_v26, %v1774_v55  ;;  %v1777_v61 = vmul.f32 %v5250_v19, %v3980_v58  ;;  %3160 = vst.msk [vmem:[%s5936_s7 + $0xc0] sm:$0xff] %vm553_vm0, %v2617_v59  ;;  %4166 = vmatprep.mubr.msk.f32.mxu1 %vm2042_vm2, %v2035_v54  ;;  %v2038_v1 = vmax.f32 %v1910_v57, 0.0 }
 0x1c9   :  { %v1634_v2 = vpop.f32.mrf.mxu0  ;;  %v4024_v62 = vpop.f32.mrf.mxu1  ;;  %4167 = vmatmul.mubr.msk.f32.gmra.mxu1 %vm2042_vm2, %v2036_v56 }
 0x1ca   :  { %v2037_v63 = vmax.f32 %v1909_v60, 0.0  ;;  %v1776_v0 = vmul.f32 %v5250_v19, %v1634_v2  ;;  %3163 = vst.msk [vmem:[%s5936_s7 + $0xd8] sm:$0xff] %vm553_vm0, %v4024_v62  ;;  %v1912_v3 = vadd.f32 %v5260_v26, %v1777_v61 }
 0x1cb   :  { %v2627_v5 = vpop.f32.mrf.mxu1 }
 0x1cc   :  { %v1911_v6 = vadd.f32 %v5260_v26, %v1776_v0  ;;  %3162 = vst.msk [vmem:[%s5936_s7 + $0xd0] sm:$0xff] %vm553_vm0, %v2627_v5  ;;  %4169 = vmatprep.mubr.msk.f32.mxu1 %vm2042_vm2, %v2037_v63  ;;  %v2040_v8 = vmax.f32 %v1912_v3, 0.0 }
 0x1cd   :  { %v4027_v7 = vpop.f32.mrf.mxu1  ;;  %4170 = vmatmul.mubr.msk.f32.gmra.mxu1 %vm2042_vm2, %v2038_v1 }
 0x1ce   :  { %v2039_v19 = vmax.f32 %v1911_v6, 0.0  ;;  %3165 = vst.msk [vmem:[%s5936_s7 + $0xe8] sm:$0xff] %vm553_vm0, %v4027_v7 }
 0x1cf   :  { %v2637_v9 = vpop.f32.mrf.mxu1 }
 0x1d0   :  { %3164 = vst.msk [vmem:[%s5936_s7 + $0xe0] sm:$0xff] %vm553_vm0, %v2637_v9  ;;  %4172 = vmatprep.mubr.msk.f32.mxu1 %vm2042_vm2, %v2039_v19 }
 0x1d1   :  { %v4030_v26 = vpop.f32.mrf.mxu1  ;;  %4173 = vmatmul.mubr.msk.f32.gmra.mxu1 %vm2042_vm2, %v2040_v8 }
 0x1d2   :  { %3167 = vst.msk [vmem:[%s5936_s7 + $0xf8] sm:$0xff] %vm553_vm0, %v4030_v26 }
 0x1d3   :  { %v2647_v10 = vpop.f32.mrf.mxu1 }
 0x1d4   :  { %3166 = vst.msk [vmem:[%s5936_s7 + $0xf0] sm:$0xff] %vm553_vm0, %v2647_v10 }
 0x1d5   :  { %v4033_v11 = vpop.f32.mrf.mxu1 }
 0x1d6   :  { %3169 = vst.msk [vmem:[%s5936_s7 + $0x108] sm:$0xff] %vm553_vm0, %v4033_v11 }
 0x1d7   :  { %v2657_v43 = vpop.f32.mrf.mxu1 }
 0x1d8   :  { %3168 = vst.msk [vmem:[%s5936_s7 + $0x100] sm:$0xff] %vm553_vm0, %v2657_v43 }
 0x1d9   :  { %v4036_v12 = vpop.f32.mrf.mxu1 }
 0x1da   :  { %3171 = vst.msk [vmem:[%s5936_s7 + $0x118] sm:$0xff] %vm553_vm0, %v4036_v12 }
 0x1db   :  { %v2667_v13 = vpop.f32.mrf.mxu1 }
 0x1dc   :  { %3170 = vst.msk [vmem:[%s5936_s7 + $0x110] sm:$0xff] %vm553_vm0, %v2667_v13 }
 0x1dd   :  { %v4039_v14 = vpop.f32.mrf.mxu1 }
 0x1de   :  { %3173 = vst.msk [vmem:[%s5936_s7 + $0x128] sm:$0xff] %vm553_vm0, %v4039_v14 }
 0x1df   :  { %v2677_v15 = vpop.f32.mrf.mxu1 }
 0x1e0   :  { %3172 = vst.msk [vmem:[%s5936_s7 + $0x120] sm:$0xff] %vm553_vm0, %v2677_v15 }
 0x1e1   :  { %v4042_v16 = vpop.f32.mrf.mxu1 }
 0x1e2   :  { %3175 = vst.msk [vmem:[%s5936_s7 + $0x138] sm:$0xff] %vm553_vm0, %v4042_v16 }
 0x1e3   :  { %v2687_v17 = vpop.f32.mrf.mxu1 }
 0x1e4   :  { %3174 = vst.msk [vmem:[%s5936_s7 + $0x130] sm:$0xff] %vm553_vm0, %v2687_v17 }
 0x1e5   :  { %v4045_v18 = vpop.f32.mrf.mxu1 }
 0x1e6   :  { %3177 = vst.msk [vmem:[%s5936_s7 + $0x148] sm:$0xff] %vm553_vm0, %v4045_v18 }
 0x1e7   :  { %v2697_v20 = vpop.f32.mrf.mxu1 }
 0x1e8   :  { %3176 = vst.msk [vmem:[%s5936_s7 + $0x140] sm:$0xff] %vm553_vm0, %v2697_v20 }
 0x1e9   :  { %v4048_v21 = vpop.f32.mrf.mxu1 }
 0x1ea   :  { %3179 = vst.msk [vmem:[%s5936_s7 + $0x158] sm:$0xff] %vm553_vm0, %v4048_v21 }
 0x1eb   :  { %v2707_v22 = vpop.f32.mrf.mxu1 }
 0x1ec   :  { %3178 = vst.msk [vmem:[%s5936_s7 + $0x150] sm:$0xff] %vm553_vm0, %v2707_v22 }
 0x1ed   :  { %v4051_v39 = vpop.f32.mrf.mxu1 }
 0x1ee   :  { %3181 = vst.msk [vmem:[%s5936_s7 + $0x168] sm:$0xff] %vm553_vm0, %v4051_v39 }
 0x1ef   :  { %v2717_v23 = vpop.f32.mrf.mxu1 }
 0x1f0   :  { %3180 = vst.msk [vmem:[%s5936_s7 + $0x160] sm:$0xff] %vm553_vm0, %v2717_v23 }
 0x1f1   :  { %v4054_v24 = vpop.f32.mrf.mxu1 }
 0x1f2   :  { %3183 = vst.msk [vmem:[%s5936_s7 + $0x178] sm:$0xff] %vm553_vm0, %v4054_v24 }
 0x1f3   :  { %v2727_v25 = vpop.f32.mrf.mxu1 }
 0x1f4   :  { %3182 = vst.msk [vmem:[%s5936_s7 + $0x170] sm:$0xff] %vm553_vm0, %v2727_v25 }
 0x1f5   :  { %v4057_v27 = vpop.f32.mrf.mxu1 }
 0x1f6   :  { %3185 = vst.msk [vmem:[%s5936_s7 + $0x188] sm:$0xff] %vm553_vm0, %v4057_v27 }
 0x1f7   :  { %v2737_v28 = vpop.f32.mrf.mxu1 }
 0x1f8   :  { %3184 = vst.msk [vmem:[%s5936_s7 + $0x180] sm:$0xff] %vm553_vm0, %v2737_v28 }
 0x1f9   :  { %v4060_v29 = vpop.f32.mrf.mxu1 }
 0x1fa   :  { %3187 = vst.msk [vmem:[%s5936_s7 + $0x198] sm:$0xff] %vm553_vm0, %v4060_v29 }
 0x1fb   :  { %v2747_v30 = vpop.f32.mrf.mxu1 }
 0x1fc   :  { %3186 = vst.msk [vmem:[%s5936_s7 + $0x190] sm:$0xff] %vm553_vm0, %v2747_v30 }
 0x1fd   :  { %v4063_v31 = vpop.f32.mrf.mxu1 }
 0x1fe   :  { %3189 = vst.msk [vmem:[%s5936_s7 + $0x1a8] sm:$0xff] %vm553_vm0, %v4063_v31 }
 0x1ff   :  { %v2757_v32 = vpop.f32.mrf.mxu1 }
 0x200   :  { %3188 = vst.msk [vmem:[%s5936_s7 + $0x1a0] sm:$0xff] %vm553_vm0, %v2757_v32 }
 0x201   :  { %v4066_v48 = vpop.f32.mrf.mxu1 }
 0x202   :  { %3191 = vst.msk [vmem:[%s5936_s7 + $0x1b8] sm:$0xff] %vm553_vm0, %v4066_v48 }
 0x203   :  { %v2767_v33 = vpop.f32.mrf.mxu1 }
 0x204   :  { %3190 = vst.msk [vmem:[%s5936_s7 + $0x1b0] sm:$0xff] %vm553_vm0, %v2767_v33 }
 0x205   :  { %v4069_v34 = vpop.f32.mrf.mxu1 }
 0x206   :  { %3193 = vst.msk [vmem:[%s5936_s7 + $0x1c8] sm:$0xff] %vm553_vm0, %v4069_v34 }
 0x207   :  { %v2777_v35 = vpop.f32.mrf.mxu1 }
 0x208   :  { %3192 = vst.msk [vmem:[%s5936_s7 + $0x1c0] sm:$0xff] %vm553_vm0, %v2777_v35 }
 0x209   :  { %v4072_v36 = vpop.f32.mrf.mxu1 }
 0x20a   :  { %3195 = vst.msk [vmem:[%s5936_s7 + $0x1d8] sm:$0xff] %vm553_vm0, %v4072_v36 }
 0x20b   :  { %v2787_v37 = vpop.f32.mrf.mxu1 }
 0x20c   :  { %3194 = vst.msk [vmem:[%s5936_s7 + $0x1d0] sm:$0xff] %vm553_vm0, %v2787_v37 }
 0x20d   :  { %v4075_v38 = vpop.f32.mrf.mxu1 }
 0x20e   :  { %3197 = vst.msk [vmem:[%s5936_s7 + $0x1e8] sm:$0xff] %vm553_vm0, %v4075_v38 }
 0x20f   :  { %v2797_v40 = vpop.f32.mrf.mxu1 }
 0x210   :  { %3196 = vst.msk [vmem:[%s5936_s7 + $0x1e0] sm:$0xff] %vm553_vm0, %v2797_v40 }
 0x211   :  { %v4078_v41 = vpop.f32.mrf.mxu1 }
 0x212   :  { %3199 = vst.msk [vmem:[%s5936_s7 + $0x1f8] sm:$0xff] %vm553_vm0, %v4078_v41 }
 0x213   :  { %v2807_v42 = vpop.f32.mrf.mxu1 }
 0x214   :  { %3198 = vst.msk [vmem:[%s5936_s7 + $0x1f0] sm:$0xff] %vm553_vm0, %v2807_v42 }
 0x215   :  { %v4081_v4 = vpop.f32.mrf.mxu1 }
 0x216   :  { %3201 = vst.msk [vmem:[%s5936_s7 + $0x208] sm:$0xff] %vm553_vm0, %v4081_v4 }
 0x217   :  { %v2817_v44 = vpop.f32.mrf.mxu1 }
 0x218   :  { %3200 = vst.msk [vmem:[%s5936_s7 + $0x200] sm:$0xff] %vm553_vm0, %v2817_v44 }
 0x219   :  { %v4084_v45 = vpop.f32.mrf.mxu1 }
 0x21a   :  { %3203 = vst.msk [vmem:[%s5936_s7 + $0x218] sm:$0xff] %vm553_vm0, %v4084_v45 }
 0x21b   :  { %v2827_v46 = vpop.f32.mrf.mxu1 }
 0x21c   :  { %3202 = vst.msk [vmem:[%s5936_s7 + $0x210] sm:$0xff] %vm553_vm0, %v2827_v46 }
 0x21d   :  { %v4087_v47 = vpop.f32.mrf.mxu1 }
 0x21e   :  { %3205 = vst.msk [vmem:[%s5936_s7 + $0x228] sm:$0xff] %vm553_vm0, %v4087_v47 }
 0x21f   :  { %v2837_v49 = vpop.f32.mrf.mxu1 }
 0x220   :  { %3204 = vst.msk [vmem:[%s5936_s7 + $0x220] sm:$0xff] %vm553_vm0, %v2837_v49 }
 0x221   :  { %v4090_v50 = vpop.f32.mrf.mxu1 }
 0x222   :  { %3207 = vst.msk [vmem:[%s5936_s7 + $0x238] sm:$0xff] %vm553_vm0, %v4090_v50 }
 0x223   :  { %v2847_v51 = vpop.f32.mrf.mxu1 }
 0x224   :  { %3206 = vst.msk [vmem:[%s5936_s7 + $0x230] sm:$0xff] %vm553_vm0, %v2847_v51 }
 0x225   :  { %v4093_v52 = vpop.f32.mrf.mxu1 }
 0x226   :  { %3209 = vst.msk [vmem:[%s5936_s7 + $0x248] sm:$0xff] %vm553_vm0, %v4093_v52 }
 0x227   :  { %v2857_v53 = vpop.f32.mrf.mxu1 }
 0x228   :  { %3208 = vst.msk [vmem:[%s5936_s7 + $0x240] sm:$0xff] %vm553_vm0, %v2857_v53 }
 0x229   :  { %v4096_v54 = vpop.f32.mrf.mxu1 }
 0x22a   :  { %3211 = vst.msk [vmem:[%s5936_s7 + $0x258] sm:$0xff] %vm553_vm0, %v4096_v54 }
 0x22b   :  { %v2867_v55 = vpop.f32.mrf.mxu1 }
 0x22c   :  { %3210 = vst.msk [vmem:[%s5936_s7 + $0x250] sm:$0xff] %vm553_vm0, %v2867_v55 }
 0x22d   :  { %v4099_v56 = vpop.f32.mrf.mxu1 }
 0x22e   :  { %3213 = vst.msk [vmem:[%s5936_s7 + $0x268] sm:$0xff] %vm553_vm0, %v4099_v56 }
 0x22f   :  { %v2877_v57 = vpop.f32.mrf.mxu1 }
 0x230   :  { %3212 = vst.msk [vmem:[%s5936_s7 + $0x260] sm:$0xff] %vm553_vm0, %v2877_v57 }
 0x231   :  { %v4102_v58 = vpop.f32.mrf.mxu1 }
 0x232   :  { %3215 = vst.msk [vmem:[%s5936_s7 + $0x278] sm:$0xff] %vm553_vm0, %v4102_v58 }
 0x233   :  { %v2887_v59 = vpop.f32.mrf.mxu1 }
 0x234   :  { %3214 = vst.msk [vmem:[%s5936_s7 + $0x270] sm:$0xff] %vm553_vm0, %v2887_v59 }
 0x235   :  { %v4105_v60 = vpop.f32.mrf.mxu1 }
 0x236   :  { %3217 = vst.msk [vmem:[%s5936_s7 + $0x288] sm:$0xff] %vm553_vm0, %v4105_v60 }
 0x237   :  { %v2897_v61 = vpop.f32.mrf.mxu1 }
 0x238   :  { %3216 = vst.msk [vmem:[%s5936_s7 + $0x280] sm:$0xff] %vm553_vm0, %v2897_v61 }
 0x239   :  { %v4108_v2 = vpop.f32.mrf.mxu1 }
 0x23a   :  { %3219 = vst.msk [vmem:[%s5936_s7 + $0x298] sm:$0xff] %vm553_vm0, %v4108_v2 }
 0x23b   :  { %v2907_v62 = vpop.f32.mrf.mxu1 }
 0x23c   :  { %3218 = vst.msk [vmem:[%s5936_s7 + $0x290] sm:$0xff] %vm553_vm0, %v2907_v62 }
 0x23d   :  { %v4111_v63 = vpop.f32.mrf.mxu1 }
 0x23e   :  { %3221 = vst.msk [vmem:[%s5936_s7 + $0x2a8] sm:$0xff] %vm553_vm0, %v4111_v63 }
 0x23f   :  { %v2917_v0 = vpop.f32.mrf.mxu1 }
 0x240   :  { %3220 = vst.msk [vmem:[%s5936_s7 + $0x2a0] sm:$0xff] %vm553_vm0, %v2917_v0 }
 0x241   :  { %v4114_v1 = vpop.f32.mrf.mxu1 }
 0x242   :  { %3223 = vst.msk [vmem:[%s5936_s7 + $0x2b8] sm:$0xff] %vm553_vm0, %v4114_v1 }
 0x243   :  { %v2927_v3 = vpop.f32.mrf.mxu1 }
 0x244   :  { %3222 = vst.msk [vmem:[%s5936_s7 + $0x2b0] sm:$0xff] %vm553_vm0, %v2927_v3 }
 0x245   :  { %v4117_v5 = vpop.f32.mrf.mxu1 }
 0x246   :  { %3225 = vst.msk [vmem:[%s5936_s7 + $0x2c8] sm:$0xff] %vm553_vm0, %v4117_v5 }
 0x247   :  { %v2937_v6 = vpop.f32.mrf.mxu1 }
 0x248   :  { %3224 = vst.msk [vmem:[%s5936_s7 + $0x2c0] sm:$0xff] %vm553_vm0, %v2937_v6 }
 0x249   :  { %v4120_v7 = vpop.f32.mrf.mxu1 }
 0x24a   :  { %3227 = vst.msk [vmem:[%s5936_s7 + $0x2d8] sm:$0xff] %vm553_vm0, %v4120_v7 }
 0x24b   :  { %v2947_v19 = vpop.f32.mrf.mxu1 }
 0x24c   :  { %3226 = vst.msk [vmem:[%s5936_s7 + $0x2d0] sm:$0xff] %vm553_vm0, %v2947_v19 }
 0x24d   :  { %v4123_v8 = vpop.f32.mrf.mxu1 }
 0x24e   :  { %3229 = vst.msk [vmem:[%s5936_s7 + $0x2e8] sm:$0xff] %vm553_vm0, %v4123_v8 }
 0x24f   :  { %v2957_v9 = vpop.f32.mrf.mxu1 }
 0x250   :  { %3228 = vst.msk [vmem:[%s5936_s7 + $0x2e0] sm:$0xff] %vm553_vm0, %v2957_v9 }
 0x251   :  { %v4126_v26 = vpop.f32.mrf.mxu1 }
 0x252   :  { %3231 = vst.msk [vmem:[%s5936_s7 + $0x2f8] sm:$0xff] %vm553_vm0, %v4126_v26 }
 0x253   :  { %v2967_v10 = vpop.f32.mrf.mxu1 }
 0x254   :  { %3230 = vst.msk [vmem:[%s5936_s7 + $0x2f0] sm:$0xff] %vm553_vm0, %v2967_v10 }
 0x255   :  { %v4129_v11 = vpop.f32.mrf.mxu1 }
 0x256   :  { %3233 = vst.msk [vmem:[%s5936_s7 + $0x308] sm:$0xff] %vm553_vm0, %v4129_v11 }
 0x257   :  { %v2977_v43 = vpop.f32.mrf.mxu1 }
 0x258   :  { %3232 = vst.msk [vmem:[%s5936_s7 + $0x300] sm:$0xff] %vm553_vm0, %v2977_v43 }
 0x259   :  { %v4132_v12 = vpop.f32.mrf.mxu1 }
 0x25a   :  { %3235 = vst.msk [vmem:[%s5936_s7 + $0x318] sm:$0xff] %vm553_vm0, %v4132_v12 }
 0x25b   :  { %v2987_v13 = vpop.f32.mrf.mxu1 }
 0x25c   :  { %3234 = vst.msk [vmem:[%s5936_s7 + $0x310] sm:$0xff] %vm553_vm0, %v2987_v13 }
 0x25d   :  { %v4135_v14 = vpop.f32.mrf.mxu1 }
 0x25e   :  { %3237 = vst.msk [vmem:[%s5936_s7 + $0x328] sm:$0xff] %vm553_vm0, %v4135_v14 }
 0x25f   :  { %v2997_v15 = vpop.f32.mrf.mxu1 }
 0x260   :  { %3236 = vst.msk [vmem:[%s5936_s7 + $0x320] sm:$0xff] %vm553_vm0, %v2997_v15 }
 0x261   :  { %v4138_v16 = vpop.f32.mrf.mxu1 }
 0x262   :  { %3239 = vst.msk [vmem:[%s5936_s7 + $0x338] sm:$0xff] %vm553_vm0, %v4138_v16 }
 0x263   :  { %v3007_v17 = vpop.f32.mrf.mxu1 }
 0x264   :  { %3238 = vst.msk [vmem:[%s5936_s7 + $0x330] sm:$0xff] %vm553_vm0, %v3007_v17 }
 0x265   :  { %v4141_v18 = vpop.f32.mrf.mxu1 }
 0x266   :  { %3241 = vst.msk [vmem:[%s5936_s7 + $0x348] sm:$0xff] %vm553_vm0, %v4141_v18 }
 0x267   :  { %v3017_v20 = vpop.f32.mrf.mxu1 }
 0x268   :  { %3240 = vst.msk [vmem:[%s5936_s7 + $0x340] sm:$0xff] %vm553_vm0, %v3017_v20 }
 0x269   :  { %v4144_v21 = vpop.f32.mrf.mxu1 }
 0x26a   :  { %3243 = vst.msk [vmem:[%s5936_s7 + $0x358] sm:$0xff] %vm553_vm0, %v4144_v21 }
 0x26b   :  { %v3027_v22 = vpop.f32.mrf.mxu1 }
 0x26c   :  { %3242 = vst.msk [vmem:[%s5936_s7 + $0x350] sm:$0xff] %vm553_vm0, %v3027_v22 }
 0x26d   :  { %v4147_v39 = vpop.f32.mrf.mxu1 }
 0x26e   :  { %3245 = vst.msk [vmem:[%s5936_s7 + $0x368] sm:$0xff] %vm553_vm0, %v4147_v39 }
 0x26f   :  { %v3037_v23 = vpop.f32.mrf.mxu1 }
 0x270   :  { %3244 = vst.msk [vmem:[%s5936_s7 + $0x360] sm:$0xff] %vm553_vm0, %v3037_v23 }
 0x271   :  { %v4150_v24 = vpop.f32.mrf.mxu1 }
 0x272   :  { %3247 = vst.msk [vmem:[%s5936_s7 + $0x378] sm:$0xff] %vm553_vm0, %v4150_v24 }
 0x273   :  { %v3047_v25 = vpop.f32.mrf.mxu1 }
 0x274   :  { %3246 = vst.msk [vmem:[%s5936_s7 + $0x370] sm:$0xff] %vm553_vm0, %v3047_v25 }
 0x275   :  { %v4153_v27 = vpop.f32.mrf.mxu1 }
 0x276   :  { %3249 = vst.msk [vmem:[%s5936_s7 + $0x388] sm:$0xff] %vm553_vm0, %v4153_v27 }
 0x277   :  { %v3057_v28 = vpop.f32.mrf.mxu1 }
 0x278   :  { %3248 = vst.msk [vmem:[%s5936_s7 + $0x380] sm:$0xff] %vm553_vm0, %v3057_v28 }
 0x279   :  { %v4156_v29 = vpop.f32.mrf.mxu1 }
 0x27a   :  { %3251 = vst.msk [vmem:[%s5936_s7 + $0x398] sm:$0xff] %vm553_vm0, %v4156_v29 }
 0x27b   :  { %v3067_v30 = vpop.f32.mrf.mxu1 }
 0x27c   :  { %3250 = vst.msk [vmem:[%s5936_s7 + $0x390] sm:$0xff] %vm553_vm0, %v3067_v30 }
 0x27d   :  { %v4159_v31 = vpop.f32.mrf.mxu1 }
 0x27e   :  { %3253 = vst.msk [vmem:[%s5936_s7 + $0x3a8] sm:$0xff] %vm553_vm0, %v4159_v31 }
 0x27f   :  { %v3077_v32 = vpop.f32.mrf.mxu1 }
 0x280   :  { %3252 = vst.msk [vmem:[%s5936_s7 + $0x3a0] sm:$0xff] %vm553_vm0, %v3077_v32 }
 0x281   :  { %v4162_v48 = vpop.f32.mrf.mxu1 }
 0x282   :  { %3255 = vst.msk [vmem:[%s5936_s7 + $0x3b8] sm:$0xff] %vm553_vm0, %v4162_v48 }
 0x283   :  { %v3087_v33 = vpop.f32.mrf.mxu1 }
 0x284   :  { %3254 = vst.msk [vmem:[%s5936_s7 + $0x3b0] sm:$0xff] %vm553_vm0, %v3087_v33 }
 0x285   :  { %v4165_v34 = vpop.f32.mrf.mxu1 }
 0x286   :  { %3257 = vst.msk [vmem:[%s5936_s7 + $0x3c8] sm:$0xff] %vm553_vm0, %v4165_v34 }
 0x287   :  { %v3097_v35 = vpop.f32.mrf.mxu1 }
 0x288   :  { %3256 = vst.msk [vmem:[%s5936_s7 + $0x3c0] sm:$0xff] %vm553_vm0, %v3097_v35 }
 0x289   :  { %v4168_v36 = vpop.f32.mrf.mxu1 }
 0x28a   :  { %3259 = vst.msk [vmem:[%s5936_s7 + $0x3d8] sm:$0xff] %vm553_vm0, %v4168_v36 }
 0x28b   :  { %v3107_v37 = vpop.f32.mrf.mxu1 }
 0x28c   :  { %3258 = vst.msk [vmem:[%s5936_s7 + $0x3d0] sm:$0xff] %vm553_vm0, %v3107_v37 }
 0x28d   :  { %v4171_v38 = vpop.f32.mrf.mxu1 }
 0x28e   :  { %3261 = vst.msk [vmem:[%s5936_s7 + $0x3e8] sm:$0xff] %vm553_vm0, %v4171_v38 }
 0x28f   :  { %v3117_v40 = vpop.f32.mrf.mxu1 }
 0x290   :  { %3260 = vst.msk [vmem:[%s5936_s7 + $0x3e0] sm:$0xff] %vm553_vm0, %v3117_v40 }
 0x291   :  { %v4174_v41 = vpop.f32.mrf.mxu1 }
 0x292   :  { %3263 = vst.msk [vmem:[%s5936_s7 + $0x3f8] sm:$0xff] %vm553_vm0, %v4174_v41 }
 0x293   :  { %v3127_v42 = vpop.f32.mrf.mxu1 }
 0x294   :  { %3262 = vst.msk [vmem:[%s5936_s7 + $0x3f0] sm:$0xff] %vm553_vm0, %v3127_v42 }

</bundles_post_ra>
